<compile_context>
chip_gen: v6e
topology: v6e:2x2x1
jax: 0.10.0
libtpu: 0.0.40
codegen_flags: <defaults>
</compile_context>

<pallas_src>
import functools

import jax
import jax.numpy as jnp
from jax.experimental import pallas as pl
from jax.experimental.pallas import tpu as pltpu

MXU_DTYPE = jnp.bfloat16  # MXU-native on v5e/v6e/v7x; accumulation stays f32.


def _fused_kernel(x_ref, masks_ref, w1_ref, b1_ref, w2_ref, b2_ref,
                  w3_ref, b3_ref, w4_ref, b4_ref, o_ref, *, h, w):
    """Fused 4-layer 3x3 conv stack for one image.

    x_ref:     (1, Cin_pad, H*W)        f32, channels on sublanes, spatial on lanes
    masks_ref: (9, H*W)                 f32 border-validity masks, one per tap
    wN_ref:    (CoutN_pad, 9*CinN_pad)  bf16 im2col weight matrices
    bN_ref:    (CoutN_pad, 1)           f32 biases
    o_ref:     (1, 1, H*W)              f32
    """
    hw = h * w
    masks = masks_ref[...]                                   # (9, hw) f32

    def conv3x3(act, w_ref, b_ref):
        # Build the im2col matrix with rolls (XLU) + border masks, then run a
        # single lane-dense MXU matmul: (Cout, 9*Cin) @ (9*Cin, H*W).
        parts = []
        for dy in range(3):
            for dx in range(3):
                tap = dy * 3 + dx
                s = (dy - 1) * w + (dx - 1)                  # flat source offset
                if s == 0:                                   # center tap: identity
                    parts.append(act)
                else:
                    shifted = pltpu.roll(act, shift=(-s) % hw, axis=1)
                    parts.append(shifted * masks[tap:tap + 1, :])
        patches = jnp.concatenate(parts, axis=0).astype(MXU_DTYPE)   # (9*Cin, hw)
        acc = jnp.dot(w_ref[...], patches,
                      preferred_element_type=jnp.float32)            # (Cout, hw)
        return acc + b_ref[...]

    x = x_ref[0]                                             # (Cin_pad, hw) f32

    a = conv3x3(x, w1_ref, b1_ref)
    a = jnp.where(a > 0.5, a, 0.0)                           # nn.Threshold(0.5, 0)
    # nn.Dropout(p=0.5): identity in eval mode.
    a = jnp.maximum(conv3x3(a, w2_ref, b2_ref), 0.0)         # ReLU
    a = jnp.maximum(conv3x3(a, w3_ref, b3_ref), 0.0)         # ReLU
    a = jnp.maximum(conv3x3(a, w4_ref, b4_ref), 0.0)         # ReLU, (8, hw); row 0 is real
    o_ref[...] = a[0:1, :].reshape(o_ref.shape)


def _round_up(n, m):
    return (n + m - 1) // m * m


def _prep_layer(w_oihw, b, cin_pad, cout_pad):
    """OIHW conv weights -> zero-padded (Cout_pad, 9*Cin_pad) bf16 im2col matrix."""
    cout, cin = w_oihw.shape[0], w_oihw.shape[1]
    wp = jnp.pad(w_oihw.astype(jnp.float32),
                 ((0, cout_pad - cout), (0, cin_pad - cin), (0, 0), (0, 0)))
    bp = jnp.pad(b.astype(jnp.float32), ((0, cout_pad - cout),))
    # (Cout, Cin, ky, kx) -> (Cout, ky, kx, Cin) -> (Cout, 9*Cin): column index
    # is tap*Cin + cin with tap = ky*3 + kx, matching the kernel's concat order.
    w_mat = jnp.transpose(wp, (0, 2, 3, 1)).reshape(cout_pad, 9 * cin_pad)
    return w_mat.astype(MXU_DTYPE), bp.reshape(cout_pad, 1)


def _tap_masks(h, w):
    """(9, H*W) f32 validity masks implementing 'same' zero padding per tap."""
    hh = jnp.arange(h).reshape(h, 1)
    ww = jnp.arange(w).reshape(1, w)
    masks = []
    for dy in range(3):
        for dx in range(3):
            oy, ox = dy - 1, dx - 1
            m = ((hh + oy >= 0) & (hh + oy < h) &
                 (ww + ox >= 0) & (ww + ox < w))
            masks.append(m.reshape(h * w))
    return jnp.stack(masks).astype(jnp.float32)


def rohit_conv_forward(x_nchw, params):
    n, c, h, w = x_nchw.shape
    hw = h * w
    cin_pad = _round_up(c, 8)

    # Lane-dense activation layout: (N, C_pad, H*W), spatial on the lane axis.
    x = x_nchw.astype(jnp.float32).reshape(n, c, hw)
    x = jnp.pad(x, ((0, 0), (0, cin_pad - c), (0, 0)))

    (w1, b1), (w2, b2), (w3, b3), (w4, b4) = params
    w1m, b1c = _prep_layer(w1, b1, cin_pad, 32)
    w2m, b2c = _prep_layer(w2, b2, 32, 64)
    w3m, b3c = _prep_layer(w3, b3, 64, 8)    # Cout 3 -> 8 (extra channels are 0)
    w4m, b4c = _prep_layer(w4, b4, 8, 8)     # Cin 3 -> 8, Cout 1 -> 8 (row 0 used)

    masks = _tap_masks(h, w)

    kernel = functools.partial(_fused_kernel, h=h, w=w)

    def _const2d(arr):
        # Constant (weights / biases / masks): same block every grid step, so
        # it is DMA'd once and stays resident in VMEM across the batch.
        return pl.BlockSpec(arr.shape, lambda i: (0, 0))

    out = pl.pallas_call(
        kernel,
        out_shape=jax.ShapeDtypeStruct((n, 1, hw), jnp.float32),
        grid_spec=pltpu.PrefetchScalarGridSpec(
            num_scalar_prefetch=0,
            grid=(n,),
            in_specs=[
                pl.BlockSpec((1, cin_pad, hw), lambda i: (i, 0, 0)),
                _const2d(masks),
                _const2d(w1m), _const2d(b1c),
                _const2d(w2m), _const2d(b2c),
                _const2d(w3m), _const2d(b3c),
                _const2d(w4m), _const2d(b4c),
            ],
            out_specs=pl.BlockSpec((1, 1, hw), lambda i: (i, 0, 0)),
        ),
        compiler_params=pltpu.CompilerParams(
            dimension_semantics=("parallel",)),
    )(x, masks, w1m, b1c, w2m, b2c, w3m, b3c, w4m, b4c)

    return out.reshape(n, 1, h, w)   # back to NCHW: (N, 1, H, W)


def init_params(key):
    """Deterministic parameter init (shapes match the PyTorch module)."""
    shapes = [
        (32, 3, 3, 3),   # conv1: Conv2d(3, 32, 3)
        (64, 32, 3, 3),  # conv2: Conv2d(32, 64, 3)
        (3, 64, 3, 3),   # conv3: Conv2d(64, 3, 3)
        (1, 3, 3, 3),    # conv4: Conv2d(3, 1, 3)
    ]
    params = []
    for i, s in enumerate(shapes):
        kw, kb = jax.random.split(jax.random.fold_in(key, i))
        fan_in = s[1] * s[2] * s[3]
        bound = 1.0 / jnp.sqrt(fan_in)
        wgt = jax.random.uniform(kw, s, jnp.float32, -bound, bound)
        bias = jax.random.uniform(kb, (s[0],), jnp.float32, -bound, bound)
        params.append((wgt, bias))
    return params


if __name__ == "__main__":
    key = jax.random.PRNGKey(0)
    k_in, k_par = jax.random.split(key)

    # Small example input consistent with Conv2d(3, ...): N=2, C=3, H=W=16.
    x = jax.random.normal(k_in, (2, 3, 16, 16), jnp.float32)
    params = init_params(k_par)

    out = jax.jit(rohit_conv_forward)(x, params)
    out = jax.block_until_ready(out)

    assert out.shape == (2, 1, 16, 16), out.shape
    assert out.dtype == jnp.float32
    print("KERNEL_OK")
</pallas_src>

<mosaic_0001>
module attributes {stable_mosaic.version = 11 : i64} {
  func.func @_fused_kernel(%arg0: i32, %arg1: memref<1x8x256xf32, #tpu.memory_space<vmem>>, %arg2: memref<9x256xf32, #tpu.memory_space<vmem>>, %arg3: memref<32x72xbf16, #tpu.memory_space<vmem>>, %arg4: memref<32x1xf32, #tpu.memory_space<vmem>>, %arg5: memref<64x288xbf16, #tpu.memory_space<vmem>>, %arg6: memref<64x1xf32, #tpu.memory_space<vmem>>, %arg7: memref<8x576xbf16, #tpu.memory_space<vmem>>, %arg8: memref<8x1xf32, #tpu.memory_space<vmem>>, %arg9: memref<8x72xbf16, #tpu.memory_space<vmem>>, %arg10: memref<8x1xf32, #tpu.memory_space<vmem>>, %arg11: memref<1x1x256xf32, #tpu.memory_space<vmem>>) attributes {dimension_semantics = [#tpu.dimension_semantics<parallel>], iteration_bounds = array<i64: 2>, scalar_prefetch = 0 : i64, scratch_operands = 0 : i64, tpu.core_type = #tpu.core_type<tc>, window_params = [{transform_indices = @transform_0, window_bounds = array<i64: 1, 8, 256>}, {pipeline_mode = #tpu.pipeline_mode<synchronous>, transform_indices = @transform_1, window_bounds = array<i64: 9, 256>}, {pipeline_mode = #tpu.pipeline_mode<synchronous>, transform_indices = @transform_2, window_bounds = array<i64: 32, 72>}, {pipeline_mode = #tpu.pipeline_mode<synchronous>, transform_indices = @transform_3, window_bounds = array<i64: 32, 1>}, {pipeline_mode = #tpu.pipeline_mode<synchronous>, transform_indices = @transform_4, window_bounds = array<i64: 64, 288>}, {pipeline_mode = #tpu.pipeline_mode<synchronous>, transform_indices = @transform_5, window_bounds = array<i64: 64, 1>}, {pipeline_mode = #tpu.pipeline_mode<synchronous>, transform_indices = @transform_6, window_bounds = array<i64: 8, 576>}, {pipeline_mode = #tpu.pipeline_mode<synchronous>, transform_indices = @transform_7, window_bounds = array<i64: 8, 1>}, {pipeline_mode = #tpu.pipeline_mode<synchronous>, transform_indices = @transform_8, window_bounds = array<i64: 8, 72>}, {pipeline_mode = #tpu.pipeline_mode<synchronous>, transform_indices = @transform_9, window_bounds = array<i64: 8, 1>}, {transform_indices = @transform_10, window_bounds = array<i64: 1, 1, 256>}]} {
    %c0 = arith.constant 0 : index
    %c0_0 = arith.constant 0 : index
    %0 = vector.load %arg2[%c0, %c0_0] : memref<9x256xf32, #tpu.memory_space<vmem>>, vector<9x256xf32>
    %c0_1 = arith.constant 0 : index
    %c0_2 = arith.constant 0 : index
    %c0_3 = arith.constant 0 : index
    %1 = vector.load %arg1[%c0_1, %c0_2, %c0_3] : memref<1x8x256xf32, #tpu.memory_space<vmem>>, vector<1x8x256xf32>
    %2 = vector.shape_cast %1 : vector<1x8x256xf32> to vector<8x256xf32>
    %c17_i32 = arith.constant 17 : i32
    %3 = tpu.dynamic_rotate %2 by %c17_i32 dim 1 : vector<8x256xf32>, i32 -> vector<8x256xf32>
    %4 = vector.extract_strided_slice %0 {offsets = [0, 0], sizes = [1, 256], strides = [1, 1]} : vector<9x256xf32> to vector<1x256xf32>
    %5 = vector.broadcast %4 : vector<1x256xf32> to vector<8x256xf32>
    %6 = arith.mulf %3, %5 : vector<8x256xf32>
    %c16_i32 = arith.constant 16 : i32
    %7 = tpu.dynamic_rotate %2 by %c16_i32 dim 1 : vector<8x256xf32>, i32 -> vector<8x256xf32>
    %8 = vector.extract_strided_slice %0 {offsets = [1, 0], sizes = [1, 256], strides = [1, 1]} : vector<9x256xf32> to vector<1x256xf32>
    %9 = vector.broadcast %8 : vector<1x256xf32> to vector<8x256xf32>
    %10 = arith.mulf %7, %9 : vector<8x256xf32>
    %c15_i32 = arith.constant 15 : i32
    %11 = tpu.dynamic_rotate %2 by %c15_i32 dim 1 : vector<8x256xf32>, i32 -> vector<8x256xf32>
    %12 = vector.extract_strided_slice %0 {offsets = [2, 0], sizes = [1, 256], strides = [1, 1]} : vector<9x256xf32> to vector<1x256xf32>
    %13 = vector.broadcast %12 : vector<1x256xf32> to vector<8x256xf32>
    %14 = arith.mulf %11, %13 : vector<8x256xf32>
    %c1_i32 = arith.constant 1 : i32
    %15 = tpu.dynamic_rotate %2 by %c1_i32 dim 1 : vector<8x256xf32>, i32 -> vector<8x256xf32>
    %16 = vector.extract_strided_slice %0 {offsets = [3, 0], sizes = [1, 256], strides = [1, 1]} : vector<9x256xf32> to vector<1x256xf32>
    %17 = vector.broadcast %16 : vector<1x256xf32> to vector<8x256xf32>
    %18 = arith.mulf %15, %17 : vector<8x256xf32>
    %c255_i32 = arith.constant 255 : i32
    %19 = tpu.dynamic_rotate %2 by %c255_i32 dim 1 : vector<8x256xf32>, i32 -> vector<8x256xf32>
    %20 = vector.extract_strided_slice %0 {offsets = [5, 0], sizes = [1, 256], strides = [1, 1]} : vector<9x256xf32> to vector<1x256xf32>
    %21 = vector.broadcast %20 : vector<1x256xf32> to vector<8x256xf32>
    %22 = arith.mulf %19, %21 : vector<8x256xf32>
    %c241_i32 = arith.constant 241 : i32
    %23 = tpu.dynamic_rotate %2 by %c241_i32 dim 1 : vector<8x256xf32>, i32 -> vector<8x256xf32>
    %24 = vector.extract_strided_slice %0 {offsets = [6, 0], sizes = [1, 256], strides = [1, 1]} : vector<9x256xf32> to vector<1x256xf32>
    %25 = vector.broadcast %24 : vector<1x256xf32> to vector<8x256xf32>
    %26 = arith.mulf %23, %25 : vector<8x256xf32>
    %c240_i32 = arith.constant 240 : i32
    %27 = tpu.dynamic_rotate %2 by %c240_i32 dim 1 : vector<8x256xf32>, i32 -> vector<8x256xf32>
    %28 = vector.extract_strided_slice %0 {offsets = [7, 0], sizes = [1, 256], strides = [1, 1]} : vector<9x256xf32> to vector<1x256xf32>
    %29 = vector.broadcast %28 : vector<1x256xf32> to vector<8x256xf32>
    %30 = arith.mulf %27, %29 : vector<8x256xf32>
    %c239_i32 = arith.constant 239 : i32
    %31 = tpu.dynamic_rotate %2 by %c239_i32 dim 1 : vector<8x256xf32>, i32 -> vector<8x256xf32>
    %32 = vector.extract_strided_slice %0 {offsets = [8, 0], sizes = [1, 256], strides = [1, 1]} : vector<9x256xf32> to vector<1x256xf32>
    %33 = vector.broadcast %32 : vector<1x256xf32> to vector<8x256xf32>
    %34 = arith.mulf %31, %33 : vector<8x256xf32>
    %35 = tpu.concatenate %6, %10, %14, %18, %2, %22, %26, %30, %34 in 0 : vector<8x256xf32>, vector<8x256xf32>, vector<8x256xf32>, vector<8x256xf32>, vector<8x256xf32>, vector<8x256xf32>, vector<8x256xf32>, vector<8x256xf32>, vector<8x256xf32> -> vector<72x256xf32>
    %36 = arith.truncf %35 : vector<72x256xf32> to vector<72x256xbf16>
    %c0_4 = arith.constant 0 : index
    %c0_5 = arith.constant 0 : index
    %37 = vector.load %arg3[%c0_4, %c0_5] : memref<32x72xbf16, #tpu.memory_space<vmem>>, vector<32x72xbf16>
    %cst = arith.constant dense<0.000000e+00> : vector<32x256xf32>
    %38 = tpu.matmul %37, %36, %cst {dimension_numbers = #tpu.dot_dimension_numbers<[1], [0], [0], [1], [0, 0, 1, 1], [], []>} : vector<32x72xbf16>, vector<72x256xbf16>, vector<32x256xf32> -> vector<32x256xf32>
    %c0_6 = arith.constant 0 : index
    %c0_7 = arith.constant 0 : index
    %39 = vector.load %arg4[%c0_6, %c0_7] : memref<32x1xf32, #tpu.memory_space<vmem>>, vector<32x1xf32>
    %40 = vector.broadcast %39 : vector<32x1xf32> to vector<32x256xf32>
    %41 = arith.addf %38, %40 : vector<32x256xf32>
    %cst_8 = arith.constant 5.000000e-01 : f32
    %42 = vector.broadcast %cst_8 : f32 to vector<32x256xf32>
    %43 = arith.cmpf ogt, %41, %42 : vector<32x256xf32>
    %cst_9 = arith.constant 0.000000e+00 : f32
    %44 = vector.broadcast %cst_9 : f32 to vector<32x256xf32>
    %45 = arith.select %43, %41, %44 : vector<32x256xi1>, vector<32x256xf32>
    %c17_i32_10 = arith.constant 17 : i32
    %46 = tpu.dynamic_rotate %45 by %c17_i32_10 dim 1 : vector<32x256xf32>, i32 -> vector<32x256xf32>
    %47 = vector.extract_strided_slice %0 {offsets = [0, 0], sizes = [1, 256], strides = [1, 1]} : vector<9x256xf32> to vector<1x256xf32>
    %48 = vector.broadcast %47 : vector<1x256xf32> to vector<32x256xf32>
    %49 = arith.mulf %46, %48 : vector<32x256xf32>
    %c16_i32_11 = arith.constant 16 : i32
    %50 = tpu.dynamic_rotate %45 by %c16_i32_11 dim 1 : vector<32x256xf32>, i32 -> vector<32x256xf32>
    %51 = vector.extract_strided_slice %0 {offsets = [1, 0], sizes = [1, 256], strides = [1, 1]} : vector<9x256xf32> to vector<1x256xf32>
    %52 = vector.broadcast %51 : vector<1x256xf32> to vector<32x256xf32>
    %53 = arith.mulf %50, %52 : vector<32x256xf32>
    %c15_i32_12 = arith.constant 15 : i32
    %54 = tpu.dynamic_rotate %45 by %c15_i32_12 dim 1 : vector<32x256xf32>, i32 -> vector<32x256xf32>
    %55 = vector.extract_strided_slice %0 {offsets = [2, 0], sizes = [1, 256], strides = [1, 1]} : vector<9x256xf32> to vector<1x256xf32>
    %56 = vector.broadcast %55 : vector<1x256xf32> to vector<32x256xf32>
    %57 = arith.mulf %54, %56 : vector<32x256xf32>
    %c1_i32_13 = arith.constant 1 : i32
    %58 = tpu.dynamic_rotate %45 by %c1_i32_13 dim 1 : vector<32x256xf32>, i32 -> vector<32x256xf32>
    %59 = vector.extract_strided_slice %0 {offsets = [3, 0], sizes = [1, 256], strides = [1, 1]} : vector<9x256xf32> to vector<1x256xf32>
    %60 = vector.broadcast %59 : vector<1x256xf32> to vector<32x256xf32>
    %61 = arith.mulf %58, %60 : vector<32x256xf32>
    %c255_i32_14 = arith.constant 255 : i32
    %62 = tpu.dynamic_rotate %45 by %c255_i32_14 dim 1 : vector<32x256xf32>, i32 -> vector<32x256xf32>
    %63 = vector.extract_strided_slice %0 {offsets = [5, 0], sizes = [1, 256], strides = [1, 1]} : vector<9x256xf32> to vector<1x256xf32>
    %64 = vector.broadcast %63 : vector<1x256xf32> to vector<32x256xf32>
    %65 = arith.mulf %62, %64 : vector<32x256xf32>
    %c241_i32_15 = arith.constant 241 : i32
    %66 = tpu.dynamic_rotate %45 by %c241_i32_15 dim 1 : vector<32x256xf32>, i32 -> vector<32x256xf32>
    %67 = vector.extract_strided_slice %0 {offsets = [6, 0], sizes = [1, 256], strides = [1, 1]} : vector<9x256xf32> to vector<1x256xf32>
    %68 = vector.broadcast %67 : vector<1x256xf32> to vector<32x256xf32>
    %69 = arith.mulf %66, %68 : vector<32x256xf32>
    %c240_i32_16 = arith.constant 240 : i32
    %70 = tpu.dynamic_rotate %45 by %c240_i32_16 dim 1 : vector<32x256xf32>, i32 -> vector<32x256xf32>
    %71 = vector.extract_strided_slice %0 {offsets = [7, 0], sizes = [1, 256], strides = [1, 1]} : vector<9x256xf32> to vector<1x256xf32>
    %72 = vector.broadcast %71 : vector<1x256xf32> to vector<32x256xf32>
    %73 = arith.mulf %70, %72 : vector<32x256xf32>
    %c239_i32_17 = arith.constant 239 : i32
    %74 = tpu.dynamic_rotate %45 by %c239_i32_17 dim 1 : vector<32x256xf32>, i32 -> vector<32x256xf32>
    %75 = vector.extract_strided_slice %0 {offsets = [8, 0], sizes = [1, 256], strides = [1, 1]} : vector<9x256xf32> to vector<1x256xf32>
    %76 = vector.broadcast %75 : vector<1x256xf32> to vector<32x256xf32>
    %77 = arith.mulf %74, %76 : vector<32x256xf32>
    %78 = tpu.concatenate %49, %53, %57, %61, %45, %65, %69, %73, %77 in 0 : vector<32x256xf32>, vector<32x256xf32>, vector<32x256xf32>, vector<32x256xf32>, vector<32x256xf32>, vector<32x256xf32>, vector<32x256xf32>, vector<32x256xf32>, vector<32x256xf32> -> vector<288x256xf32>
    %79 = arith.truncf %78 : vector<288x256xf32> to vector<288x256xbf16>
    %c0_18 = arith.constant 0 : index
    %c0_19 = arith.constant 0 : index
    %80 = vector.load %arg5[%c0_18, %c0_19] : memref<64x288xbf16, #tpu.memory_space<vmem>>, vector<64x288xbf16>
    %cst_20 = arith.constant dense<0.000000e+00> : vector<64x256xf32>
    %81 = tpu.matmul %80, %79, %cst_20 {dimension_numbers = #tpu.dot_dimension_numbers<[1], [0], [0], [1], [0, 0, 1, 1], [], []>} : vector<64x288xbf16>, vector<288x256xbf16>, vector<64x256xf32> -> vector<64x256xf32>
    %c0_21 = arith.constant 0 : index
    %c0_22 = arith.constant 0 : index
    %82 = vector.load %arg6[%c0_21, %c0_22] : memref<64x1xf32, #tpu.memory_space<vmem>>, vector<64x1xf32>
    %83 = vector.broadcast %82 : vector<64x1xf32> to vector<64x256xf32>
    %84 = arith.addf %81, %83 : vector<64x256xf32>
    %cst_23 = arith.constant 0.000000e+00 : f32
    %85 = vector.broadcast %cst_23 : f32 to vector<64x256xf32>
    %86 = arith.maximumf %84, %85 : vector<64x256xf32>
    %c17_i32_24 = arith.constant 17 : i32
    %87 = tpu.dynamic_rotate %86 by %c17_i32_24 dim 1 : vector<64x256xf32>, i32 -> vector<64x256xf32>
    %88 = vector.extract_strided_slice %0 {offsets = [0, 0], sizes = [1, 256], strides = [1, 1]} : vector<9x256xf32> to vector<1x256xf32>
    %89 = vector.broadcast %88 : vector<1x256xf32> to vector<64x256xf32>
    %90 = arith.mulf %87, %89 : vector<64x256xf32>
    %c16_i32_25 = arith.constant 16 : i32
    %91 = tpu.dynamic_rotate %86 by %c16_i32_25 dim 1 : vector<64x256xf32>, i32 -> vector<64x256xf32>
    %92 = vector.extract_strided_slice %0 {offsets = [1, 0], sizes = [1, 256], strides = [1, 1]} : vector<9x256xf32> to vector<1x256xf32>
    %93 = vector.broadcast %92 : vector<1x256xf32> to vector<64x256xf32>
    %94 = arith.mulf %91, %93 : vector<64x256xf32>
    %c15_i32_26 = arith.constant 15 : i32
    %95 = tpu.dynamic_rotate %86 by %c15_i32_26 dim 1 : vector<64x256xf32>, i32 -> vector<64x256xf32>
    %96 = vector.extract_strided_slice %0 {offsets = [2, 0], sizes = [1, 256], strides = [1, 1]} : vector<9x256xf32> to vector<1x256xf32>
    %97 = vector.broadcast %96 : vector<1x256xf32> to vector<64x256xf32>
    %98 = arith.mulf %95, %97 : vector<64x256xf32>
    %c1_i32_27 = arith.constant 1 : i32
    %99 = tpu.dynamic_rotate %86 by %c1_i32_27 dim 1 : vector<64x256xf32>, i32 -> vector<64x256xf32>
    %100 = vector.extract_strided_slice %0 {offsets = [3, 0], sizes = [1, 256], strides = [1, 1]} : vector<9x256xf32> to vector<1x256xf32>
    %101 = vector.broadcast %100 : vector<1x256xf32> to vector<64x256xf32>
    %102 = arith.mulf %99, %101 : vector<64x256xf32>
    %c255_i32_28 = arith.constant 255 : i32
    %103 = tpu.dynamic_rotate %86 by %c255_i32_28 dim 1 : vector<64x256xf32>, i32 -> vector<64x256xf32>
    %104 = vector.extract_strided_slice %0 {offsets = [5, 0], sizes = [1, 256], strides = [1, 1]} : vector<9x256xf32> to vector<1x256xf32>
    %105 = vector.broadcast %104 : vector<1x256xf32> to vector<64x256xf32>
    %106 = arith.mulf %103, %105 : vector<64x256xf32>
    %c241_i32_29 = arith.constant 241 : i32
    %107 = tpu.dynamic_rotate %86 by %c241_i32_29 dim 1 : vector<64x256xf32>, i32 -> vector<64x256xf32>
    %108 = vector.extract_strided_slice %0 {offsets = [6, 0], sizes = [1, 256], strides = [1, 1]} : vector<9x256xf32> to vector<1x256xf32>
    %109 = vector.broadcast %108 : vector<1x256xf32> to vector<64x256xf32>
    %110 = arith.mulf %107, %109 : vector<64x256xf32>
    %c240_i32_30 = arith.constant 240 : i32
    %111 = tpu.dynamic_rotate %86 by %c240_i32_30 dim 1 : vector<64x256xf32>, i32 -> vector<64x256xf32>
    %112 = vector.extract_strided_slice %0 {offsets = [7, 0], sizes = [1, 256], strides = [1, 1]} : vector<9x256xf32> to vector<1x256xf32>
    %113 = vector.broadcast %112 : vector<1x256xf32> to vector<64x256xf32>
    %114 = arith.mulf %111, %113 : vector<64x256xf32>
    %c239_i32_31 = arith.constant 239 : i32
    %115 = tpu.dynamic_rotate %86 by %c239_i32_31 dim 1 : vector<64x256xf32>, i32 -> vector<64x256xf32>
    %116 = vector.extract_strided_slice %0 {offsets = [8, 0], sizes = [1, 256], strides = [1, 1]} : vector<9x256xf32> to vector<1x256xf32>
    %117 = vector.broadcast %116 : vector<1x256xf32> to vector<64x256xf32>
    %118 = arith.mulf %115, %117 : vector<64x256xf32>
    %119 = tpu.concatenate %90, %94, %98, %102, %86, %106, %110, %114, %118 in 0 : vector<64x256xf32>, vector<64x256xf32>, vector<64x256xf32>, vector<64x256xf32>, vector<64x256xf32>, vector<64x256xf32>, vector<64x256xf32>, vector<64x256xf32>, vector<64x256xf32> -> vector<576x256xf32>
    %120 = arith.truncf %119 : vector<576x256xf32> to vector<576x256xbf16>
    %c0_32 = arith.constant 0 : index
    %c0_33 = arith.constant 0 : index
    %121 = vector.load %arg7[%c0_32, %c0_33] : memref<8x576xbf16, #tpu.memory_space<vmem>>, vector<8x576xbf16>
    %cst_34 = arith.constant dense<0.000000e+00> : vector<8x256xf32>
    %122 = tpu.matmul %121, %120, %cst_34 {dimension_numbers = #tpu.dot_dimension_numbers<[1], [0], [0], [1], [0, 0, 1, 1], [], []>} : vector<8x576xbf16>, vector<576x256xbf16>, vector<8x256xf32> -> vector<8x256xf32>
    %c0_35 = arith.constant 0 : index
    %c0_36 = arith.constant 0 : index
    %123 = vector.load %arg8[%c0_35, %c0_36] : memref<8x1xf32, #tpu.memory_space<vmem>>, vector<8x1xf32>
    %124 = vector.broadcast %123 : vector<8x1xf32> to vector<8x256xf32>
    %125 = arith.addf %122, %124 : vector<8x256xf32>
    %cst_37 = arith.constant 0.000000e+00 : f32
    %126 = vector.broadcast %cst_37 : f32 to vector<8x256xf32>
    %127 = arith.maximumf %125, %126 : vector<8x256xf32>
    %c17_i32_38 = arith.constant 17 : i32
    %128 = tpu.dynamic_rotate %127 by %c17_i32_38 dim 1 : vector<8x256xf32>, i32 -> vector<8x256xf32>
    %129 = vector.extract_strided_slice %0 {offsets = [0, 0], sizes = [1, 256], strides = [1, 1]} : vector<9x256xf32> to vector<1x256xf32>
    %130 = vector.broadcast %129 : vector<1x256xf32> to vector<8x256xf32>
    %131 = arith.mulf %128, %130 : vector<8x256xf32>
    %c16_i32_39 = arith.constant 16 : i32
    %132 = tpu.dynamic_rotate %127 by %c16_i32_39 dim 1 : vector<8x256xf32>, i32 -> vector<8x256xf32>
    %133 = vector.extract_strided_slice %0 {offsets = [1, 0], sizes = [1, 256], strides = [1, 1]} : vector<9x256xf32> to vector<1x256xf32>
    %134 = vector.broadcast %133 : vector<1x256xf32> to vector<8x256xf32>
    %135 = arith.mulf %132, %134 : vector<8x256xf32>
    %c15_i32_40 = arith.constant 15 : i32
    %136 = tpu.dynamic_rotate %127 by %c15_i32_40 dim 1 : vector<8x256xf32>, i32 -> vector<8x256xf32>
    %137 = vector.extract_strided_slice %0 {offsets = [2, 0], sizes = [1, 256], strides = [1, 1]} : vector<9x256xf32> to vector<1x256xf32>
    %138 = vector.broadcast %137 : vector<1x256xf32> to vector<8x256xf32>
    %139 = arith.mulf %136, %138 : vector<8x256xf32>
    %c1_i32_41 = arith.constant 1 : i32
    %140 = tpu.dynamic_rotate %127 by %c1_i32_41 dim 1 : vector<8x256xf32>, i32 -> vector<8x256xf32>
    %141 = vector.extract_strided_slice %0 {offsets = [3, 0], sizes = [1, 256], strides = [1, 1]} : vector<9x256xf32> to vector<1x256xf32>
    %142 = vector.broadcast %141 : vector<1x256xf32> to vector<8x256xf32>
    %143 = arith.mulf %140, %142 : vector<8x256xf32>
    %c255_i32_42 = arith.constant 255 : i32
    %144 = tpu.dynamic_rotate %127 by %c255_i32_42 dim 1 : vector<8x256xf32>, i32 -> vector<8x256xf32>
    %145 = vector.extract_strided_slice %0 {offsets = [5, 0], sizes = [1, 256], strides = [1, 1]} : vector<9x256xf32> to vector<1x256xf32>
    %146 = vector.broadcast %145 : vector<1x256xf32> to vector<8x256xf32>
    %147 = arith.mulf %144, %146 : vector<8x256xf32>
    %c241_i32_43 = arith.constant 241 : i32
    %148 = tpu.dynamic_rotate %127 by %c241_i32_43 dim 1 : vector<8x256xf32>, i32 -> vector<8x256xf32>
    %149 = vector.extract_strided_slice %0 {offsets = [6, 0], sizes = [1, 256], strides = [1, 1]} : vector<9x256xf32> to vector<1x256xf32>
    %150 = vector.broadcast %149 : vector<1x256xf32> to vector<8x256xf32>
    %151 = arith.mulf %148, %150 : vector<8x256xf32>
    %c240_i32_44 = arith.constant 240 : i32
    %152 = tpu.dynamic_rotate %127 by %c240_i32_44 dim 1 : vector<8x256xf32>, i32 -> vector<8x256xf32>
    %153 = vector.extract_strided_slice %0 {offsets = [7, 0], sizes = [1, 256], strides = [1, 1]} : vector<9x256xf32> to vector<1x256xf32>
    %154 = vector.broadcast %153 : vector<1x256xf32> to vector<8x256xf32>
    %155 = arith.mulf %152, %154 : vector<8x256xf32>
    %c239_i32_45 = arith.constant 239 : i32
    %156 = tpu.dynamic_rotate %127 by %c239_i32_45 dim 1 : vector<8x256xf32>, i32 -> vector<8x256xf32>
    %157 = vector.extract_strided_slice %0 {offsets = [8, 0], sizes = [1, 256], strides = [1, 1]} : vector<9x256xf32> to vector<1x256xf32>
    %158 = vector.broadcast %157 : vector<1x256xf32> to vector<8x256xf32>
    %159 = arith.mulf %156, %158 : vector<8x256xf32>
    %160 = tpu.concatenate %131, %135, %139, %143, %127, %147, %151, %155, %159 in 0 : vector<8x256xf32>, vector<8x256xf32>, vector<8x256xf32>, vector<8x256xf32>, vector<8x256xf32>, vector<8x256xf32>, vector<8x256xf32>, vector<8x256xf32>, vector<8x256xf32> -> vector<72x256xf32>
    %161 = arith.truncf %160 : vector<72x256xf32> to vector<72x256xbf16>
    %c0_46 = arith.constant 0 : index
    %c0_47 = arith.constant 0 : index
    %162 = vector.load %arg9[%c0_46, %c0_47] : memref<8x72xbf16, #tpu.memory_space<vmem>>, vector<8x72xbf16>
    %cst_48 = arith.constant dense<0.000000e+00> : vector<8x256xf32>
    %163 = tpu.matmul %162, %161, %cst_48 {dimension_numbers = #tpu.dot_dimension_numbers<[1], [0], [0], [1], [0, 0, 1, 1], [], []>} : vector<8x72xbf16>, vector<72x256xbf16>, vector<8x256xf32> -> vector<8x256xf32>
    %c0_49 = arith.constant 0 : index
    %c0_50 = arith.constant 0 : index
    %164 = vector.load %arg10[%c0_49, %c0_50] : memref<8x1xf32, #tpu.memory_space<vmem>>, vector<8x1xf32>
    %165 = vector.broadcast %164 : vector<8x1xf32> to vector<8x256xf32>
    %166 = arith.addf %163, %165 : vector<8x256xf32>
    %cst_51 = arith.constant 0.000000e+00 : f32
    %167 = vector.broadcast %cst_51 : f32 to vector<8x256xf32>
    %168 = arith.maximumf %166, %167 : vector<8x256xf32>
    %169 = vector.extract_strided_slice %168 {offsets = [0, 0], sizes = [1, 256], strides = [1, 1]} : vector<8x256xf32> to vector<1x256xf32>
    %170 = vector.shape_cast %169 : vector<1x256xf32> to vector<1x1x256xf32>
    %c0_52 = arith.constant 0 : index
    %c0_53 = arith.constant 0 : index
    %c0_54 = arith.constant 0 : index
    %171 = vector.load %arg11[%c0_52, %c0_53, %c0_54] : memref<1x1x256xf32, #tpu.memory_space<vmem>>, vector<1x1x256xf32>
    tpu.vector_store %arg11[%c0_52, %c0_53, %c0_54], %170 {strides = array<i32>} : memref<1x1x256xf32, #tpu.memory_space<vmem>>, vector<1x1x256xf32>,
    return
  }
  func.func @transform_0(%arg0: i32) -> (i32, i32, i32) {
    %c0_i32 = arith.constant 0 : i32
    %c0_i32_0 = arith.constant 0 : i32
    %c0_i32_1 = arith.constant 0 : i32
    return %arg0, %c0_i32, %c0_i32_0 : i32, i32, i32
  }
  func.func @transform_1(%arg0: i32) -> (i32, i32) {
    %c0_i32 = arith.constant 0 : i32
    %c0_i32_0 = arith.constant 0 : i32
    %c0_i32_1 = arith.constant 0 : i32
    return %c0_i32, %c0_i32_0 : i32, i32
  }
  func.func @transform_2(%arg0: i32) -> (i32, i32) {
    %c0_i32 = arith.constant 0 : i32
    %c0_i32_0 = arith.constant 0 : i32
    %c0_i32_1 = arith.constant 0 : i32
    return %c0_i32, %c0_i32_0 : i32, i32
  }
  func.func @transform_3(%arg0: i32) -> (i32, i32) {
    %c0_i32 = arith.constant 0 : i32
    %c0_i32_0 = arith.constant 0 : i32
    %c0_i32_1 = arith.constant 0 : i32
    return %c0_i32, %c0_i32_0 : i32, i32
  }
  func.func @transform_4(%arg0: i32) -> (i32, i32) {
    %c0_i32 = arith.constant 0 : i32
    %c0_i32_0 = arith.constant 0 : i32
    %c0_i32_1 = arith.constant 0 : i32
    return %c0_i32, %c0_i32_0 : i32, i32
  }
  func.func @transform_5(%arg0: i32) -> (i32, i32) {
    %c0_i32 = arith.constant 0 : i32
    %c0_i32_0 = arith.constant 0 : i32
    %c0_i32_1 = arith.constant 0 : i32
    return %c0_i32, %c0_i32_0 : i32, i32
  }
  func.func @transform_6(%arg0: i32) -> (i32, i32) {
    %c0_i32 = arith.constant 0 : i32
    %c0_i32_0 = arith.constant 0 : i32
    %c0_i32_1 = arith.constant 0 : i32
    return %c0_i32, %c0_i32_0 : i32, i32
  }
  func.func @transform_7(%arg0: i32) -> (i32, i32) {
    %c0_i32 = arith.constant 0 : i32
    %c0_i32_0 = arith.constant 0 : i32
    %c0_i32_1 = arith.constant 0 : i32
    return %c0_i32, %c0_i32_0 : i32, i32
  }
  func.func @transform_8(%arg0: i32) -> (i32, i32) {
    %c0_i32 = arith.constant 0 : i32
    %c0_i32_0 = arith.constant 0 : i32
    %c0_i32_1 = arith.constant 0 : i32
    return %c0_i32, %c0_i32_0 : i32, i32
  }
  func.func @transform_9(%arg0: i32) -> (i32, i32) {
    %c0_i32 = arith.constant 0 : i32
    %c0_i32_0 = arith.constant 0 : i32
    %c0_i32_1 = arith.constant 0 : i32
    return %c0_i32, %c0_i32_0 : i32, i32
  }
  func.func @transform_10(%arg0: i32) -> (i32, i32, i32) {
    %c0_i32 = arith.constant 0 : i32
    %c0_i32_0 = arith.constant 0 : i32
    %c0_i32_1 = arith.constant 0 : i32
    return %arg0, %c0_i32, %c0_i32_0 : i32, i32, i32
  }
}

</mosaic_0001>

<bundles_post_ra>
// kernel: rohit_conv_forward.1
= control target key start
LH: loop header
LB: loop body
LE: loop exit
PB: predicated region body
PF: predicated region fallthrough
CT: control target
= control target key end

     0   :  { %s2345_s13 = smov 0   ;;  %s4503_s0 = inlined_call_operand.vmem [shape: f32[2,8,256], index: 0, kind: input, shape index: {}]   ;;  %s4504_s1 = inlined_call_operand.vmem [shape: f32[9,256], index: 1, kind: input, shape index: {}]   ;;  %s4505_s2 = inlined_call_operand.vmem [shape: bf16[32,72], index: 2, kind: input, shape index: {}]   ;;  %s4506_s3 = inlined_call_operand.vmem [shape: f32[32,1], index: 3, kind: input, shape index: {}]   ;;  %s4507_s4 = inlined_call_operand.vmem [shape: bf16[64,288], index: 4, kind: input, shape index: {}]   ;;  %s4508_s5 = inlined_call_operand.vmem [shape: f32[64,1], index: 5, kind: input, shape index: {}]   ;;  %s4509_s6 = inlined_call_operand.vmem [shape: bf16[8,576], index: 6, kind: input, shape index: {}]   ;;  %s4510_s7 = inlined_call_operand.vmem [shape: f32[8,1], index: 7, kind: input, shape index: {}]   ;;  %s4511_s8 = inlined_call_operand.vmem [shape: bf16[8,72], index: 8, kind: input, shape index: {}]   ;;  %s4512_s9 = inlined_call_operand.vmem [shape: f32[8,1], index: 9, kind: input, shape index: {}]   ;;  %s4513_s10 = inlined_call_operand.vmem [shape: f32[2,1,256], index: 10, kind: output, shape index: {}]  }
   0x1 LB: > { %s2173_s14 = sadd.s32 4294967295, %s2278_s13   ;;  %p2177_p0 = scmp.ge.s32.totalorder %s2278_s13, 1  ;;  %s2278_s13 = sphi %s2345_s13, %s20_s13  }
   0x2   : > { %p312_p1 = scmp.lt.s32.totalorder %s2278_s13, 3 }
   0x4   : > { %p313_p2 = pnand %p2177_p0, %p312_p1 }
   0x6   : > { %316 = sbr.rel (%p313_p2) target bundleno = 1753 (0x6d9), region = 60 }
   0xb   : > { %p349_p3 = scmp.lt.s32.totalorder %s2173_s14, 1  ;;  %s2280_s19 = smov 113   ;;  %v4519_v2 = vmov 0   ;;  %v520_v3 = vld [vmem:[%s4506_s3 + $0x18] sm:$0xff]  ;;  %v519_v4 = vld [vmem:[%s4506_s3 + $0x10] sm:$0xff]  ;;  %v517_v5 = vld [vmem:[%s4506_s3] sm:$0xff]  ;;  %v4518_v7 = vlaneseq }
   0xc   : > { %s2281_s20 = smov 111   ;;  %s2282_s21 = smov 112   ;;  %597 = vmatprep.mubr.bf16.mxu0 %v4519_v2  ;;  %2246 = vset.pattern.permute.xlu1 %v4519_v2  ;;  %v518_v6 = vld [vmem:[%s4506_s3 + $0x8] sm:$0xff]  ;;  %v2420_v13 = vld [vmem:[%s4504_s1] sm:$0xff]  ;;  %v2433_v16 = vld [vmem:[%s4504_s1 + $0x18] ss:$0 sm:$0xff] }
   0xd   : > { %s4859_s14 = smov (!%p349_p3, %s2173_s14), 1  ;;  %s2283_s22 = smov 127   ;;  %2245 = vset.pattern.permute.xlu0 %v4519_v2  ;;  %v2411_v8 = vshrl.u32 %v4518_v7, 7  ;;  %v2414_v9 = vand.u32 127, %v4518_v7  ;;  %v2426_v15 = vld [vmem:[%s4504_s1 + $0x8] sm:$0xff]  ;;  %4615 = vst [vmem:[#allocation3_spill] sm:$0xff] %v2433_v16 }
   0xe   : > { %s2226_s15 = sshll.u32 %s4859_s14, 4  ;;  %s2284_s23 = smov 15   ;;  %v2438_v17 = vld [vmem:[%s4504_s1 + $0x10] ss:$0 sm:$0xff]  ;;  %vm4515_vm3 = vcmask 1043456   ;;  %vm4514_vm9 = vcmask 588800  }
   0xf   : > { %s353_s18 = scalar_lea.vmem %s4503_s0, %s2226_s15  ;;  %s2285_s24 = smov 1   ;;  %4614 = vst [vmem:[#allocation2_spill] sm:$0xff] %v2411_v8  ;;  %v461_v12 = vsub.s32 6, %v2411_v8  ;;  %v478_v14 = vsub.s32 7, %v2411_v8  ;;  %vm4516_vm0 = vcmp.lt.s32.totalorder %v2414_v9, 111  ;;  %vm456_vm1 = vcmp.lt.s32.totalorder %v2414_v9, 113 }
  0x10   : > { %v2359_v0 = vld [vmem:[%s353_s18] sm:$0xff]  ;;  %v2361_v1 = vld [vmem:[%s353_s18 + $0x8] sm:$0xff]  ;;  %s2287_s25 = smov 17   ;;  %s2288_s26 = smov 16   ;;  %vm473_vm2 = vcmp.lt.s32.totalorder %v2414_v9, 112  ;;  %v444_v21 = vsub.s32 5, %v2411_v8 }
  0x11   : > { %452 = vrot.lane.b32.xlu1 %v2359_v0, %s2280_s19  ;;  %486 = vrot.lane.b32.xlu0 %v2359_v0, %s2281_s20  ;;  %v2441_v18 = vrot.slane %v2420_v13, %v461_v12  ;;  %v2446_v22 = vrot.slane %v2426_v15, %v461_v12  ;;  %v2451_v24 = vrot.slane %v2420_v13, %v478_v14  ;;  %vm4517_vm4 = vcmp.lt.s32.totalorder %v2414_v9, 127 }
  0x12   : > { %v2458_v27 = vrot.slane %v2426_v15, %v478_v14  ;;  %v2466_v35 = vrot.slane %v2420_v13, %v444_v21  ;;  %v2474_v39 = vrot.slane %v2426_v15, %v444_v21  ;;  %v410_v52 = vsub.s32 2, %v2411_v8 }
  0x13   : > { %4616 = vst [vmem:[#allocation4_spill] sm:$0xff] %v2441_v18  ;;  %4617 = vst [vmem:[#allocation5_spill] sm:$0xff] %v2446_v22  ;;  %v427_v53 = vsub.s32 3, %v2411_v8  ;;  %vm405_vm5 = vcmp.lt.s32.totalorder %v2414_v9, 15  ;;  %vm422_vm6 = vcmp.lt.s32.totalorder %v2414_v9, 1  ;;  %vm371_vm7 = vcmp.lt.s32.totalorder %v2414_v9, 17 }
  0x14   : > { %4618 = vst [vmem:[#allocation6_spill] sm:$0xff] %v2451_v24  ;;  %4619 = vst [vmem:[#allocation7_spill] sm:$0xff] %v2458_v27  ;;  %v2494_v58 = vrot.slane %v2420_v13, %v410_v52  ;;  %v2497_v59 = vrot.slane %v2426_v15, %v410_v52  ;;  %vm388_vm8 = vcmp.lt.s32.totalorder %v2414_v9, 16 }
  0x15   : > { %454 = vrot.lane.b32.xlu1 %v2361_v1, %s2280_s19  ;;  %488 = vrot.lane.b32.xlu0 %v2361_v1, %s2281_s20  ;;  %v2500_v60 = vrot.slane %v2420_v13, %v427_v53  ;;  %v2503_v61 = vrot.slane %v2426_v15, %v427_v53 }
  0x16   : > { %4620 = vst [vmem:[#allocation8_spill] sm:$0xff] %v2494_v58  ;;  %4621 = vst [vmem:[#allocation9_spill] sm:$0xff] %v2497_v59 }
  0x19   : > { %471 = vrot.lane.b32.xlu1 %v2361_v1, %s2282_s21  ;;  %469 = vrot.lane.b32.xlu0 %v2359_v0, %s2282_s21 }
  0x1d   : > { %437 = vrot.lane.b32.xlu1 %v2361_v1, %s2283_s22  ;;  %435 = vrot.lane.b32.xlu0 %v2359_v0, %s2283_s22 }
  0x21   : > { %403 = vrot.lane.b32.xlu1 %v2361_v1, %s2284_s23  ;;  %401 = vrot.lane.b32.xlu0 %v2359_v0, %s2284_s23 }
  0x25   : > { %420 = vrot.lane.b32.xlu1 %v2361_v1, %s2285_s24  ;;  %418 = vrot.lane.b32.xlu0 %v2359_v0, %s2285_s24 }
  0x29   : > { %367 = vrot.lane.b32.xlu1 %v2361_v1, %s2287_s25  ;;  %365 = vrot.lane.b32.xlu0 %v2359_v0, %s2287_s25 }
  0x2d   : > { %386 = vrot.lane.b32.xlu1 %v2361_v1, %s2288_s26  ;;  %384 = vrot.lane.b32.xlu0 %v2359_v0, %s2288_s26 }
  0x31   : > { %538 = vperm.xlu1 %2246, %v520_v3   ;;  %533 = vperm.xlu0 %2245, %v519_v4  }
  0x35   : > { %523 = vperm.xlu1 %2246, %v517_v5   ;;  %528 = vperm.xlu0 %2245, %v518_v6   ;;  %v376_v5 = vsub.s32 0, %v2411_v8  ;;  %v393_v6 = vsub.s32 1, %v2411_v8 }
  0x83   : > { %v453_v10 = vpop.permute.xlu1 %452  ;;  %v487_v11 = vpop.permute.xlu0 %486 }
  0x87   : > { %v455_v19 = vpop.permute.xlu1 %454  ;;  %v489_v20 = vpop.permute.xlu0 %488 }
  0x88   : > { %v491_v23 = vsel %vm4516_vm0, %v487_v11, %v489_v20  ;;  %v492_v25 = vsel %vm4516_vm0, %v489_v20, %v487_v11  ;;  %v457_v26 = vsel %vm456_vm1, %v453_v10, %v455_v19  ;;  %v458_v30 = vsel %vm456_vm1, %v455_v19, %v453_v10 }
  0x89   : > { %v502_v28 = vmul.f32 %v2433_v16, %v492_v25  ;;  %v501_v29 = vmul.f32 %v2438_v17, %v491_v23  ;;  %v467_v36 = vmul.f32 %v2441_v18, %v457_v26  ;;  %v468_v40 = vmul.f32 %v2446_v22, %v458_v30 }
  0x8a   : > { %v2522_v25 = vrot.slane %v2420_v13, %v376_v5  ;;  %v2525_v26 = vrot.slane %v2426_v15, %v376_v5 }
  0x8b   : > { %v472_v31 = vpop.permute.xlu1 %471  ;;  %v470_v32 = vpop.permute.xlu0 %469  ;;  %v512_v33 = vpack.c.bf16 %v502_v28, %v502_v28  ;;  %v511_v34 = vpack.c.bf16 %v501_v29, %v501_v29  ;;  %v2528_v28 = vrot.slane %v2420_v13, %v393_v6  ;;  %v2531_v29 = vrot.slane %v2426_v15, %v393_v6 }
  0x8c   : > { %v474_v37 = vsel %vm473_vm2, %v470_v32, %v472_v31  ;;  %v475_v38 = vsel %vm473_vm2, %v472_v31, %v470_v32 }
  0x8d   : > { %v484_v41 = vmul.f32 %v2451_v24, %v474_v37  ;;  %v485_v42 = vmul.f32 %v2458_v27, %v475_v38  ;;  %2185 = vmatprep.subr.msk.bf16.mxu0 %vm4515_vm3, %v512_v33  ;;  %v560_v43 = vsel %vm4515_vm3, %v511_v34, 0 }
  0x8e   : > { %572 = vmatpush1.bf16.msra.mxu0 %v560_v43  ;;  %v2248_v43 = vld [vmem:[%s4505_s2 + $0x8] sm:$0xff]  }
  0x8f   : > { %v438_v44 = vpop.permute.xlu1 %437  ;;  %v436_v45 = vpop.permute.xlu0 %435  ;;  %v510_v46 = vpack.c.bf16 %v485_v42, %v468_v40  ;;  %v509_v47 = vpack.c.bf16 %v484_v41, %v467_v36  ;;  %v2247_v42 = vld [vmem:[%s4505_s2] sm:$0xff]  }
  0x90   : > { %v440_v48 = vsel %vm4517_vm4, %v436_v45, %v438_v44  ;;  %v441_v49 = vsel %vm4517_vm4, %v438_v44, %v436_v45 }
  0x91   : > { %v450_v50 = vmul.f32 %v2466_v35, %v440_v48  ;;  %v451_v51 = vmul.f32 %v2474_v39, %v441_v49  ;;  %573 = vmatprep.subr.bf16.mxu0 %v510_v46 }
  0x92   : > { %574 = vmatpush1.bf16.msra.mxu0 %v509_v47 }
  0x93   : > { %v404_v54 = vpop.permute.xlu1 %403  ;;  %v402_v55 = vpop.permute.xlu0 %401  ;;  %v508_v56 = vpack.c.bf16 %v451_v51, %v2361_v1  ;;  %v507_v57 = vpack.c.bf16 %v450_v50, %v2359_v0 }
  0x94   : > { %v406_v62 = vsel %vm405_vm5, %v402_v55, %v404_v54  ;;  %v407_v63 = vsel %vm405_vm5, %v404_v54, %v402_v55 }
  0x95   : > { %575 = vmatprep.subr.bf16.mxu0 %v508_v56  ;;  %v416_v10 = vmul.f32 %v2494_v58, %v407_v63  ;;  %v417_v11 = vmul.f32 %v2497_v59, %v406_v62 }
  0x96   : > { %576 = vmatpush1.bf16.msra.mxu0 %v507_v57 }
  0x97   : > { %v421_v0 = vpop.permute.xlu1 %420  ;;  %v419_v1 = vpop.permute.xlu0 %418 }
  0x98   : > { %v423_v3 = vsel %vm422_vm6, %v419_v1, %v421_v0  ;;  %v424_v4 = vsel %vm422_vm6, %v421_v0, %v419_v1  ;;  %v4626_v0 = vmov 0 }
  0x99   : > { %v433_v12 = vmul.f32 %v2500_v60, %v424_v4  ;;  %v434_v14 = vmul.f32 %v2503_v61, %v423_v3  ;;  %v4629_v4 = vmov 0 }
  0x9b   : > { %v368_v19 = vpop.permute.xlu1 %367  ;;  %v366_v20 = vpop.permute.xlu0 %365  ;;  %v506_v21 = vpack.c.bf16 %v434_v14, %v417_v11  ;;  %v505_v23 = vpack.c.bf16 %v433_v12, %v416_v10 }
  0x9c   : > { %v372_v30 = vsel %vm371_vm7, %v366_v20, %v368_v19  ;;  %v373_v31 = vsel %vm371_vm7, %v368_v19, %v366_v20  ;;  %v4634_v20 = vmov 0 }
  0x9d   : > { %577 = vmatprep.subr.bf16.mxu0 %v506_v21  ;;  %v382_v13 = vmul.f32 %v2522_v25, %v373_v31  ;;  %v383_v15 = vmul.f32 %v2525_v26, %v372_v30 }
  0x9e   : > { %578 = vmatpush1.bf16.msra.mxu0 %v505_v23 }
  0x9f   : > { %v387_v32 = vpop.permute.xlu1 %386  ;;  %v385_v33 = vpop.permute.xlu0 %384 }
  0xa0   : > { %v389_v34 = vsel %vm388_vm8, %v385_v33, %v387_v32  ;;  %v390_v36 = vsel %vm388_vm8, %v387_v32, %v385_v33 }
  0xa1   : > { %v399_v37 = vmul.f32 %v2528_v28, %v390_v36  ;;  %v400_v38 = vmul.f32 %v2531_v29, %v389_v34 }
  0xa3   : > { %v504_v40 = vpack.c.bf16 %v400_v38, %v383_v15  ;;  %v503_v41 = vpack.c.bf16 %v399_v37, %v382_v13  ;;  %v2251_v38 = vld [vmem:[%s4507_s4 + $0x4] ss:$12 sps:$4 sm:$0xff]  }
  0xa4   : > { %1095 = vmatprep.mubr.bf16.mxu1 %v2251_v38 }
  0xa5   : > { %579 = vmatprep.subr.bf16.mxu0 %v504_v40 }
  0xa6   : > { %580 = vmatpush1.bf16.msra.mxu0 %v503_v41 }
  0xa9   : > { %2186 = vmatmul.mubr.msk.bf16.vlgmr.msra.gmra.mxu0 %vm4514_vm9, %v2247_v42  ;;  %v948_v42 = vld [vmem:[%s4508_s5 + $0x30] sm:$0xff] }
  0xaa   : > { %607 = vmatprep.mubr.bf16.mxu0 %v4519_v2 }
  0xac   : > { %v539_v44 = vpop.permute.xlu1 %538  ;;  %v534_v45 = vpop.permute.xlu0 %533 }
  0xb0   : > { %v524_v46 = vpop.permute.xlu1 %523  ;;  %v529_v51 = vpop.permute.xlu0 %528 }
  0xb1   : > { %2187 = vmatmul.mubr.msk.bf16.gmra.mxu0 %vm4514_vm9, %v2248_v43 }
  0xb2   : > { %1168 = vmatprep.mubr.bf16.mxu0 %v4519_v2 }
 0x169   : > { %v599_v47 = vpop.f32.mrf.mxu0 }
 0x16a   : > { %v2555_v48 = vadd.f32 %v599_v47, %v524_v46 }
 0x16b   : > { %v601_v49 = vpop.f32.mrf.mxu0 }
 0x16c   : > { %4622 = vst [vmem:[#allocation10_spill] sm:$0xff] %v2555_v48  ;;  %vm618_vm10 = vcmp.gt.f32.partialorder %v2555_v48, 0.5  ;;  %v2561_v53 = vadd.f32 %v601_v49, %v524_v46  ;;  %v949_v46 = vld [vmem:[%s4508_s5 + $0x38] sm:$0xff] }
 0x16d   : > { %v2559_v50 = vsel %vm618_vm10, %v2555_v48, 0.0  ;;  %v603_v52 = vpop.f32.mrf.mxu0 }
 0x16e   : > { %4623 = vst [vmem:[#allocation11_spill] sm:$0xff] %v2561_v53  ;;  %v2563_v54 = vadd.f32 %v603_v52, %v529_v51  ;;  %730 = vrot.lane.b32.xlu1 %v2559_v50, %s2285_s24  ;;  %vm619_vm13 = vcmp.gt.f32.partialorder %v2561_v53, 0.5 }
 0x16f   : > { %v605_v55 = vpop.f32.mrf.mxu0  ;;  %v2642_v30 = vsel %vm619_vm13, %v2561_v53, 0.0 }
 0x170   : > { %4624 = vst [vmem:[#allocation12_spill] sm:$0xff] %v2563_v54  ;;  %vm620_vm11 = vcmp.gt.f32.partialorder %v2563_v54, 0.5  ;;  %v2570_v57 = vadd.f32 %v605_v55, %v529_v51  ;;  %v947_v51 = vld [vmem:[%s4508_s5 + $0x28] sm:$0xff] }
 0x171   : > { %v2573_v62 = vsel %vm620_vm11, %v2563_v54, 0.0  ;;  %v609_v63 = vpop.f32.mrf.mxu0  ;;  %vm2575_vm12 = vmpackc.low %vm620_vm11, %vm618_vm10 }
 0x172   : > { %4625 = vst [vmem:[#allocation13_spill] sm:$0xff] %v2570_v57  ;;  %v4627_v0 = vsel %vm2575_vm12, 4294967295, %v4626_v0  ;;  %vm621_vm14 = vcmp.gt.f32.partialorder %v2570_v57, 0.5  ;;  %698 = vrot.lane.b32.xlu1 %v2559_v50, %s2284_s23  ;;  %732 = vrot.lane.b32.xlu0 %v2573_v62, %s2285_s24  ;;  %v2595_v5 = vadd.f32 %v609_v63, %v534_v45 }
 0x173   : > { %4628 = vst [vmem:[#allocation14_spill] sm:$0xff] %v4627_v0  ;;  %v611_v3 = vpop.f32.mrf.mxu0  ;;  %vm2591_vm15 = vmpackc.low %vm621_vm14, %vm619_vm13  ;;  %v2651_v31 = vsel %vm621_vm14, %v2570_v57, 0.0 }
 0x174   : > { %v4630_v4 = vsel %vm2591_vm15, 4294967295, %v4629_v4  ;;  %4632 = vst [vmem:[#allocation16_spill] sm:$0xff] %v2595_v5  ;;  %v2597_v10 = vadd.f32 %v611_v3, %v534_v45  ;;  %vm622_vm10 = vcmp.gt.f32.partialorder %v2595_v5, 0.5  ;;  %v946_v45 = vld [vmem:[%s4508_s5 + $0x20] sm:$0xff] }
 0x175   : > { %4631 = vst [vmem:[#allocation15_spill] sm:$0xff] %v4630_v4  ;;  %v613_v6 = vpop.f32.mrf.mxu0  ;;  %v630_v32 = vsel %vm622_vm10, %v2595_v5, 0.0 }
 0x176   : > { %v2599_v11 = vadd.f32 %v613_v6, %v539_v44  ;;  %666 = vrot.lane.b32.xlu1 %v2559_v50, %s2288_s26  ;;  %700 = vrot.lane.b32.xlu0 %v2573_v62, %s2284_s23  ;;  %vm623_vm3 = vcmp.gt.f32.partialorder %v2597_v10, 0.5  ;;  %v945_v6 = vld [vmem:[%s4508_s5 + $0x18] sm:$0xff] }
 0x177   : > { %v615_v12 = vpop.f32.mrf.mxu0  ;;  %v631_v34 = vsel %vm623_vm3, %v2597_v10, 0.0 }
 0x178   : > { %4633 = vst [vmem:[#allocation17_spill] sm:$0xff] %v2599_v11  ;;  %vm624_vm11 = vcmp.gt.f32.partialorder %v2599_v11, 0.5  ;;  %v2609_v19 = vadd.f32 %v615_v12, %v539_v44 }
 0x179   : > { %vm2615_vm9 = vmpackc.low %vm624_vm11, %vm622_vm10  ;;  %v632_v33 = vsel %vm624_vm11, %v2599_v11, 0.0 }
 0x17a   : > { %v4635_v20 = vsel %vm2615_vm9, 4294967295, %v4634_v20  ;;  %vm625_vm0 = vcmp.gt.f32.partialorder %v2609_v19, 0.5  ;;  %634 = vrot.lane.b32.xlu1 %v2559_v50, %s2287_s25  ;;  %668 = vrot.lane.b32.xlu0 %v2573_v62, %s2288_s26 }
 0x17b   : > { %4636 = vst [vmem:[#allocation18_spill] sm:$0xff] %v4635_v20  ;;  %vm2631_vm4 = vmpackc.low %vm625_vm0, %vm623_vm3  ;;  %v633_v36 = vsel %vm625_vm0, %v2609_v19, 0.0  ;;  %vm4639_vm0 = vcmp.lt.s32.totalorder %v2414_v9, 127 }
 0x17c   : > { %vm4640_vm3 = vmmov %vm4639_vm0 }
 0x17d   : > { %vm4641_vm13 = vmmov %vm4639_vm0 }
 0x17e   : > { %826 = vrot.lane.b32.xlu1 %v2559_v50, %s2282_s21  ;;  %636 = vrot.lane.b32.xlu0 %v2573_v62, %s2287_s25  ;;  %vm4642_vm14 = vmmov %vm4639_vm0 }
 0x17f   : > { %vm4643_vm10 = vmmov %vm4639_vm0  ;;  %v4654_v23 = vld [vmem:[#allocation17_spill] sm:$0xff] }
 0x180   : > { %vm4644_vm11 = vmmov %vm4639_vm0 }
 0x182   : > { %738 = vrot.lane.b32.xlu1 %v2642_v30, %s2285_s24  ;;  %828 = vrot.lane.b32.xlu0 %v2573_v62, %s2282_s21 }
 0x186   : > { %706 = vrot.lane.b32.xlu1 %v2642_v30, %s2284_s23  ;;  %740 = vrot.lane.b32.xlu0 %v2651_v31, %s2285_s24 }
 0x18a   : > { %674 = vrot.lane.b32.xlu1 %v2642_v30, %s2288_s26  ;;  %708 = vrot.lane.b32.xlu0 %v2651_v31, %s2284_s23 }
 0x18e   : > { %642 = vrot.lane.b32.xlu1 %v2642_v30, %s2287_s25  ;;  %676 = vrot.lane.b32.xlu0 %v2651_v31, %s2288_s26 }
 0x192   : > { %834 = vrot.lane.b32.xlu1 %v2642_v30, %s2282_s21  ;;  %644 = vrot.lane.b32.xlu0 %v2651_v31, %s2287_s25 }
 0x196   : > { %734 = vrot.lane.b32.xlu1 %v630_v32, %s2285_s24  ;;  %836 = vrot.lane.b32.xlu0 %v2651_v31, %s2282_s21 }
 0x19a   : > { %702 = vrot.lane.b32.xlu1 %v630_v32, %s2284_s23  ;;  %736 = vrot.lane.b32.xlu0 %v632_v33, %s2285_s24 }
 0x19e   : > { %670 = vrot.lane.b32.xlu1 %v630_v32, %s2288_s26  ;;  %704 = vrot.lane.b32.xlu0 %v632_v33, %s2284_s23 }
 0x1a2   : > { %638 = vrot.lane.b32.xlu1 %v630_v32, %s2287_s25  ;;  %672 = vrot.lane.b32.xlu0 %v632_v33, %s2288_s26 }
 0x1a6   : > { %830 = vrot.lane.b32.xlu1 %v630_v32, %s2282_s21  ;;  %640 = vrot.lane.b32.xlu0 %v632_v33, %s2287_s25 }
 0x1aa   : > { %742 = vrot.lane.b32.xlu1 %v631_v34, %s2285_s24  ;;  %832 = vrot.lane.b32.xlu0 %v632_v33, %s2282_s21 }
 0x1ae   : > { %798 = vrot.lane.b32.xlu1 %v630_v32, %s2280_s19  ;;  %744 = vrot.lane.b32.xlu0 %v633_v36, %s2285_s24 }
 0x1b2   : > { %710 = vrot.lane.b32.xlu1 %v631_v34, %s2284_s23  ;;  %800 = vrot.lane.b32.xlu0 %v632_v33, %s2280_s19 }
 0x1b6   : > { %678 = vrot.lane.b32.xlu1 %v631_v34, %s2288_s26  ;;  %712 = vrot.lane.b32.xlu0 %v633_v36, %s2284_s23 }
 0x1ba   : > { %646 = vrot.lane.b32.xlu1 %v631_v34, %s2287_s25  ;;  %796 = vrot.lane.b32.xlu0 %v2573_v62, %s2280_s19 }
 0x1be   : > { %838 = vrot.lane.b32.xlu1 %v631_v34, %s2282_s21  ;;  %680 = vrot.lane.b32.xlu0 %v633_v36, %s2288_s26 }
 0x1c2   : > { %806 = vrot.lane.b32.xlu1 %v631_v34, %s2280_s19  ;;  %804 = vrot.lane.b32.xlu0 %v2651_v31, %s2280_s19 }
 0x1c6   : > { %794 = vrot.lane.b32.xlu1 %v2559_v50, %s2280_s19  ;;  %648 = vrot.lane.b32.xlu0 %v633_v36, %s2287_s25 }
 0x1ca   : > { %802 = vrot.lane.b32.xlu1 %v2642_v30, %s2280_s19  ;;  %768 = vrot.lane.b32.xlu0 %v632_v33, %s2283_s22 }
 0x1ce   : > { %766 = vrot.lane.b32.xlu1 %v630_v32, %s2283_s22  ;;  %840 = vrot.lane.b32.xlu0 %v633_v36, %s2282_s21 }
 0x1d2   : > { %774 = vrot.lane.b32.xlu1 %v631_v34, %s2283_s22  ;;  %764 = vrot.lane.b32.xlu0 %v2573_v62, %s2283_s22 }
 0x1d6   : > { %762 = vrot.lane.b32.xlu1 %v2559_v50, %s2283_s22  ;;  %808 = vrot.lane.b32.xlu0 %v633_v36, %s2280_s19 }
 0x1da   : > { %770 = vrot.lane.b32.xlu1 %v2642_v30, %s2283_s22  ;;  %772 = vrot.lane.b32.xlu0 %v2651_v31, %s2283_s22 }
 0x1de   : > { %862 = vrot.lane.b32.xlu1 %v630_v32, %s2281_s20  ;;  %776 = vrot.lane.b32.xlu0 %v633_v36, %s2283_s22 }
 0x1e0   : > { %v2728_v13 = vpop.permute.xlu1 %730 }
 0x1e2   : > { %870 = vrot.lane.b32.xlu1 %v631_v34, %s2281_s20  ;;  %864 = vrot.lane.b32.xlu0 %v632_v33, %s2281_s20 }
 0x1e4   : > { %v2732_v15 = vpop.permute.xlu1 %698  ;;  %v733_v37 = vpop.permute.xlu0 %732 }
 0x1e6   : > { %858 = vrot.lane.b32.xlu1 %v2559_v50, %s2281_s20  ;;  %860 = vrot.lane.b32.xlu0 %v2573_v62, %s2281_s20  ;;  %v944_v50 = vld [vmem:[%s4508_s5 + $0x10] sm:$0xff]  ;;  %v942_v62 = vld [vmem:[%s4508_s5] sm:$0xff] }
 0x1e8   : > { %v2741_v40 = vpop.permute.xlu1 %666  ;;  %v2743_v41 = vpop.permute.xlu0 %700 }
 0x1ea   : > { %866 = vrot.lane.b32.xlu1 %v2642_v30, %s2281_s20  ;;  %872 = vrot.lane.b32.xlu0 %v633_v36, %s2281_s20 }
 0x1ec   : > { %v2751_v43 = vpop.permute.xlu1 %634  ;;  %v2753_v44 = vpop.permute.xlu0 %668 }
 0x1ee   : > { %982 = vperm.xlu1 %2246, %v948_v42   ;;  %868 = vrot.lane.b32.xlu0 %v2651_v31, %s2281_s20  ;;  %v943_v31 = vld [vmem:[%s4508_s5 + $0x8] sm:$0xff] }
 0x1f0   : > { %v2763_v47 = vpop.permute.xlu1 %826  ;;  %v2765_v49 = vpop.permute.xlu0 %636 }
 0x1f2   : > { %972 = vperm.xlu1 %2246, %v946_v45   ;;  %987 = vperm.xlu0 %2245, %v949_v46  }
 0x1f4   : > { %v739_v52 = vpop.permute.xlu1 %738  ;;  %v2773_v55 = vpop.permute.xlu0 %828 }
 0x1f5   : > { %v746_v8 = vsel %vm422_vm6, %v2728_v13, %v739_v52 }
 0x1f6   : > { %962 = vperm.xlu1 %2246, %v944_v50   ;;  %977 = vperm.xlu0 %2245, %v947_v51  }
 0x1f8   : > { %v2778_v63 = vpop.permute.xlu1 %706  ;;  %v741_v3 = vpop.permute.xlu0 %740 }
 0x1f9   : > { %v747_v1 = vsel %vm422_vm6, %v733_v37, %v741_v3  ;;  %v751_v54 = vsel %vm422_vm6, %v741_v3, %v733_v37  ;;  %v750_v37 = vsel %vm422_vm6, %v739_v52, %v2728_v13 }
 0x1fa   : > { %952 = vperm.xlu1 %2246, %v942_v62   ;;  %967 = vperm.xlu0 %2245, %v945_v6   ;;  %v757_v4 = vmul.f32 %v747_v1, %v2503_v61  ;;  %v755_v1 = vmul.f32 %v746_v8, %v2503_v61  ;;  %v756_v3 = vmul.f32 %v751_v54, %v2500_v60 }
 0x1fb   : > { %v714_v54 = vsel %vm405_vm5, %v2732_v15, %v2778_v63 }
 0x1fc   : > { %v2783_v12 = vpop.permute.xlu1 %674  ;;  %v709_v30 = vpop.permute.xlu0 %708 }
 0x1fe   : > { %957 = vperm.xlu0 %2245, %v943_v31  }
 0x200   : > { %v2788_v32 = vpop.permute.xlu1 %642  ;;  %v2790_v33 = vpop.permute.xlu0 %676 }
 0x204   : > { %v2792_v34 = vpop.permute.xlu1 %834  ;;  %v2794_v36 = vpop.permute.xlu0 %644 }
 0x208   : > { %v735_v38 = vpop.permute.xlu1 %734  ;;  %v2796_v42 = vpop.permute.xlu0 %836 }
 0x20c   : > { %v703_v45 = vpop.permute.xlu1 %702  ;;  %v737_v46 = vpop.permute.xlu0 %736 }
 0x210   : > { %v2798_v50 = vpop.permute.xlu1 %670  ;;  %v705_v51 = vpop.permute.xlu0 %704 }
 0x214   : > { %v2800_v62 = vpop.permute.xlu1 %638  ;;  %v2802_v6 = vpop.permute.xlu0 %672 }
 0x218   : > { %v2804_v31 = vpop.permute.xlu1 %830  ;;  %v2806_v7 = vpop.permute.xlu0 %640 }
 0x21c   : > { %v743_v2 = vpop.permute.xlu1 %742  ;;  %v2808_v56 = vpop.permute.xlu0 %832 }
 0x21d   : > { %v752_v14 = vsel %vm422_vm6, %v743_v2, %v735_v38  ;;  %v748_v21 = vsel %vm422_vm6, %v735_v38, %v743_v2 }
 0x21e   : > { %v759_v2 = vmul.f32 %v748_v21, %v2503_v61  ;;  %v758_v20 = vmul.f32 %v752_v14, %v2500_v60  ;;  %v754_v21 = vmul.f32 %v750_v37, %v2500_v60 }
 0x220   : > { %v2819_v0 = vpop.permute.xlu1 %798  ;;  %v745_v48 = vpop.permute.xlu0 %744  ;;  %v902_v13 = vpack.c.bf16 %v756_v3, %v754_v21 }
 0x221   : > { %v753_v53 = vsel %vm422_vm6, %v745_v48, %v737_v46  ;;  %v749_v57 = vsel %vm422_vm6, %v737_v46, %v745_v48 }
 0x222   : > { %v761_v38 = vmul.f32 %v749_v57, %v2503_v61  ;;  %v760_v5 = vmul.f32 %v753_v53, %v2500_v60  ;;  %v715_v57 = vsel %vm405_vm5, %v2743_v41, %v709_v30  ;;  %v903_v53 = vpack.c.bf16 %v757_v4, %v755_v1 }
 0x223   : > { %v719_v4 = vsel %vm405_vm5, %v709_v30, %v2743_v41  ;;  %v725_v52 = vmul.f32 %v715_v57, %v2497_v59  ;;  %v718_v41 = vsel %vm405_vm5, %v2778_v63, %v2732_v15  ;;  %v723_v30 = vmul.f32 %v714_v54, %v2497_v59 }
 0x224   : > { %v711_v11 = vpop.permute.xlu1 %710  ;;  %v2837_v16 = vpop.permute.xlu0 %800  ;;  %v905_v48 = vpack.c.bf16 %v761_v38, %v759_v2  ;;  %v904_v46 = vpack.c.bf16 %v760_v5, %v758_v20  ;;  %v724_v3 = vmul.f32 %v719_v4, %v2494_v58  ;;  %v722_v57 = vmul.f32 %v718_v41, %v2494_v58 }
 0x225   : > { %v716_v14 = vsel %vm405_vm5, %v703_v45, %v711_v11  ;;  %v720_v8 = vsel %vm405_vm5, %v711_v11, %v703_v45  ;;  %v687_v4 = vsel %vm388_vm8, %v2790_v33, %v2753_v44 }
 0x226   : > { %1063 = vmatprep.subr.bf16.mxu1 %v905_v48  ;;  %v726_v45 = vmul.f32 %v720_v8, %v2494_v58  ;;  %v727_v38 = vmul.f32 %v716_v14, %v2497_v59  ;;  %v899_v14 = vpack.c.bf16 %v725_v52, %v723_v30  ;;  %v682_v8 = vsel %vm388_vm8, %v2741_v40, %v2783_v12 }
 0x227   : > { %1064 = vmatpush1.bf16.msra.mxu1 %v904_v46 }
 0x228   : > { %v679_v5 = vpop.permute.xlu1 %678  ;;  %1065 = vmatprep.subr.bf16.mxu1 %v903_v53  ;;  %v713_v20 = vpop.permute.xlu0 %712  ;;  %v683_v53 = vsel %vm388_vm8, %v2753_v44, %v2790_v33  ;;  %v686_v44 = vsel %vm388_vm8, %v2783_v12, %v2741_v40  ;;  %v691_v33 = vmul.f32 %v682_v8, %v2531_v29 }
 0x229   : > { %v717_v2 = vsel %vm405_vm5, %v705_v51, %v713_v20  ;;  %v721_v11 = vsel %vm405_vm5, %v713_v20, %v705_v51  ;;  %v684_v15 = vsel %vm388_vm8, %v2798_v50, %v679_v5  ;;  %v688_v63 = vsel %vm388_vm8, %v679_v5, %v2798_v50 }
 0x22a   : > { %v728_v37 = vmul.f32 %v721_v11, %v2494_v58  ;;  %v729_v1 = vmul.f32 %v717_v2, %v2497_v59  ;;  %v693_v52 = vmul.f32 %v683_v53, %v2531_v29  ;;  %v694_v2 = vmul.f32 %v688_v63, %v2528_v28 }
 0x22b   : > { %1066 = vmatpush1.bf16.msra.mxu1 %v902_v13  ;;  %v898_v13 = vpack.c.bf16 %v724_v3, %v722_v57  ;;  %v695_v11 = vmul.f32 %v684_v15, %v2531_v29  ;;  %v690_v3 = vmul.f32 %v686_v44, %v2528_v28  ;;  %v650_v57 = vsel %vm371_vm7, %v2751_v43, %v2788_v32 }
 0x22c   : > { %v647_v48 = vpop.permute.xlu1 %646  ;;  %v2869_v51 = vpop.permute.xlu0 %796  ;;  %v901_v46 = vpack.c.bf16 %v729_v1, %v727_v38  ;;  %v900_v21 = vpack.c.bf16 %v728_v37, %v726_v45  ;;  %v692_v37 = vmul.f32 %v687_v4, %v2528_v28  ;;  %v895_v40 = vpack.c.bf16 %v693_v52, %v691_v33 }
 0x22d   : > { %v652_v12 = vsel %vm371_vm7, %v2800_v62, %v647_v48  ;;  %v655_v63 = vsel %vm371_vm7, %v2794_v36, %v2765_v49  ;;  %v846_v33 = vsel %vm473_vm2, %v2792_v34, %v2763_v47 }
 0x22e   : > { %1067 = vmatprep.subr.bf16.mxu1 %v901_v46  ;;  %v651_v46 = vsel %vm371_vm7, %v2765_v49, %v2794_v36  ;;  %v894_v15 = vpack.c.bf16 %v692_v37, %v690_v3  ;;  %v654_v49 = vsel %vm371_vm7, %v2788_v32, %v2751_v43  ;;  %v659_v36 = vmul.f32 %v650_v57, %v2525_v26 }
 0x22f   : > { %1068 = vmatpush1.bf16.msra.mxu1 %v900_v21  ;;  %v656_v21 = vsel %vm371_vm7, %v647_v48, %v2800_v62  ;;  %v661_v8 = vmul.f32 %v651_v46, %v2525_v26  ;;  %v843_v3 = vsel %vm473_vm2, %v2773_v55, %v2796_v42 }
 0x230   : > { %v839_v54 = vpop.permute.xlu1 %838  ;;  %1069 = vmatprep.subr.bf16.mxu1 %v899_v14  ;;  %v681_v20 = vpop.permute.xlu0 %680 }
 0x231   : > { %v685_v50 = vsel %vm388_vm8, %v2802_v6, %v681_v20  ;;  %v689_v5 = vsel %vm388_vm8, %v681_v20, %v2802_v6  ;;  %v662_v20 = vmul.f32 %v656_v21, %v2522_v25  ;;  %v891_v44 = vpack.c.bf16 %v661_v8, %v659_v36 }
 0x232   : > { %v696_v45 = vmul.f32 %v689_v5, %v2528_v28  ;;  %v697_v38 = vmul.f32 %v685_v50, %v2531_v29  ;;  %v660_v50 = vmul.f32 %v655_v63, %v2522_v25  ;;  %v844_v43 = vsel %vm473_vm2, %v2804_v31, %v839_v54 }
 0x233   : > { %1070 = vmatpush1.bf16.msra.mxu1 %v898_v13  ;;  %v663_v13 = vmul.f32 %v652_v12, %v2525_v26  ;;  %v848_v32 = vsel %vm473_vm2, %v839_v54, %v2804_v31 }
 0x234   : > { %v2907_v1 = vpop.permute.xlu1 %806  ;;  %v2909_v6 = vpop.permute.xlu0 %804  ;;  %v897_v41 = vpack.c.bf16 %v697_v38, %v695_v11  ;;  %v896_v30 = vpack.c.bf16 %v696_v45, %v694_v2  ;;  %v658_v45 = vmul.f32 %v654_v49, %v2522_v25  ;;  %v847_v38 = vsel %vm473_vm2, %v2796_v42, %v2773_v55 }
 0x235   : > { %v853_v46 = vmul.f32 %v847_v38, %v2458_v27  ;;  %v855_v12 = vmul.f32 %v848_v32, %v2458_v27  ;;  %v842_v55 = vsel %vm473_vm2, %v2763_v47, %v2792_v34  ;;  %v851_v42 = vmul.f32 %v846_v33, %v2458_v27 }
 0x236   : > { %1071 = vmatprep.subr.bf16.mxu1 %v897_v41  ;;  %v816_v47 = vsel %vm456_vm1, %v2907_v1, %v2819_v0 }
 0x237   : > { %1072 = vmatpush1.bf16.msra.mxu1 %v896_v30  ;;  %v890_v30 = vpack.c.bf16 %v660_v50, %v658_v45 }
 0x238   : > { %v795_v53 = vpop.permute.xlu1 %794  ;;  %1073 = vmatprep.subr.bf16.mxu1 %v895_v40  ;;  %v649_v14 = vpop.permute.xlu0 %648  ;;  %v854_v40 = vmul.f32 %v844_v43, %v2451_v24 }
 0x239   : > { %v653_v62 = vsel %vm371_vm7, %v2806_v7, %v649_v14  ;;  %v657_v48 = vsel %vm371_vm7, %v649_v14, %v2806_v7  ;;  %v852_v14 = vmul.f32 %v843_v3, %v2451_v24 }
 0x23a   : > { %v664_v4 = vmul.f32 %v657_v48, %v2522_v25  ;;  %v665_v52 = vmul.f32 %v653_v62, %v2525_v26  ;;  %v850_v62 = vmul.f32 %v842_v55, %v2451_v24  ;;  %v812_v48 = vsel %vm456_vm1, %v2819_v0, %v2907_v1 }
 0x23b   : > { %1074 = vmatpush1.bf16.msra.mxu1 %v894_v15  ;;  %v822_v36 = vmul.f32 %v812_v48, %v2441_v18 }
 0x23c   : > { %v803_v5 = vpop.permute.xlu1 %802  ;;  %v2947_v7 = vpop.permute.xlu0 %768  ;;  %v893_v2 = vpack.c.bf16 %v665_v52, %v663_v13  ;;  %v892_v11 = vpack.c.bf16 %v664_v4, %v662_v20  ;;  %v919_v20 = vpack.c.bf16 %v853_v46, %v851_v42  ;;  %v815_v13 = vsel %vm456_vm1, %v2909_v6, %v2869_v51 }
 0x23d   : > { %v814_v34 = vsel %vm456_vm1, %v803_v5, %v795_v53  ;;  %v918_v49 = vpack.c.bf16 %v852_v14, %v850_v62  ;;  %v810_v50 = vsel %vm456_vm1, %v795_v53, %v803_v5  ;;  %v811_v53 = vsel %vm456_vm1, %v2869_v51, %v2909_v6 }
 0x23e   : > { %1075 = vmatprep.subr.bf16.mxu1 %v893_v2  ;;  %v823_v2 = vmul.f32 %v816_v47, %v2446_v22  ;;  %v821_v5 = vmul.f32 %v815_v13, %v2446_v22  ;;  %v820_v3 = vmul.f32 %v811_v53, %v2441_v18 }
 0x23f   : > { %1076 = vmatpush1.bf16.msra.mxu1 %v892_v11  ;;  %v819_v11 = vmul.f32 %v814_v34, %v2446_v22 }
 0x240   : > { %v767_v37 = vpop.permute.xlu1 %766  ;;  %1077 = vmatprep.subr.bf16.mxu1 %v891_v44  ;;  %v841_v41 = vpop.permute.xlu0 %840  ;;  %v818_v44 = vmul.f32 %v810_v50, %v2441_v18 }
 0x241   : > { %v845_v31 = vsel %vm473_vm2, %v2808_v56, %v841_v41  ;;  %v849_v54 = vsel %vm473_vm2, %v841_v41, %v2808_v56  ;;  %v915_v46 = vpack.c.bf16 %v821_v5, %v819_v11 }
 0x242   : > { %v856_v21 = vmul.f32 %v845_v31, %v2451_v24  ;;  %v857_v57 = vmul.f32 %v849_v54, %v2458_v27 }
 0x243   : > { %1078 = vmatpush1.bf16.msra.mxu1 %v890_v30 }
 0x244   : > { %v775_v15 = vpop.permute.xlu1 %774  ;;  %v765_v56 = vpop.permute.xlu0 %764  ;;  %v921_v63 = vpack.c.bf16 %v857_v57, %v855_v12  ;;  %v920_v8 = vpack.c.bf16 %v856_v21, %v854_v40  ;;  %v914_v21 = vpack.c.bf16 %v820_v3, %v818_v44 }
 0x245   : > { %v780_v41 = vsel %vm4639_vm0, %v767_v37, %v775_v15  ;;  %v784_v30 = vsel %vm4640_vm3, %v775_v15, %v767_v37  ;;  %vm4645_vm3 = vmmov %vm4639_vm0 }
 0x246   : > { %1079 = vmatprep.subr.bf16.mxu1 %v921_v63  ;;  %v790_v31 = vmul.f32 %v780_v41, %v2466_v35  ;;  %v791_v54 = vmul.f32 %v784_v30, %v2474_v39  ;;  %v4658_v41 = vld [vmem:[#allocation13_spill] sm:$0xff]  ;;  %v4659_v30 = vld [vmem:[#allocation11_spill] sm:$0xff] }
 0x247   : > { %1080 = vmatpush2.bf16.msra.mxu1 %v920_v8  ;;  %v4660_v3 = vpack.c.bf16 %v4658_v41, %v4659_v30 }
 0x248   : > { %v763_v4 = vpop.permute.xlu1 %762  ;;  %1081 = vmatprep.subr.bf16.mxu1 %v919_v20  ;;  %v809_v52 = vpop.permute.xlu0 %808 }
 0x249   : > { %v813_v0 = vsel %vm456_vm1, %v2837_v16, %v809_v52  ;;  %v817_v1 = vsel %vm456_vm1, %v809_v52, %v2837_v16 }
 0x24a   : > { %v824_v45 = vmul.f32 %v813_v0, %v2441_v18  ;;  %v825_v38 = vmul.f32 %v817_v1, %v2446_v22  ;;  %v4648_v0 = vpack.c.bf16 %v2609_v19, %v2597_v10 }
 0x24b   : > { %1082 = vmatpush2.bf16.msra.mxu1 %v918_v49 }
 0x24c   : > { %v771_v43 = vpop.permute.xlu1 %770  ;;  %v773_v16 = vpop.permute.xlu0 %772  ;;  %v917_v32 = vpack.c.bf16 %v825_v38, %v823_v2  ;;  %v916_v33 = vpack.c.bf16 %v824_v45, %v822_v36  ;;  %v4651_v38 = vld [vmem:[#allocation3_spill] sm:$0xff] }
 0x24d   : > { %v782_v51 = vsel %vm4641_vm13, %v771_v43, %v763_v4  ;;  %v783_v6 = vsel %vm4642_vm14, %v773_v16, %v765_v56  ;;  %v778_v37 = vsel %vm4643_vm10, %v763_v4, %v771_v43  ;;  %v779_v57 = vsel %vm4644_vm11, %v765_v56, %v773_v16  ;;  %v4655_v43 = vld [vmem:[#allocation16_spill] sm:$0xff] }
 0x24e   : > { %1083 = vmatprep.subr.bf16.mxu1 %v917_v32  ;;  %v787_v14 = vmul.f32 %v782_v51, %v2474_v39  ;;  %v789_v15 = vmul.f32 %v783_v6, %v2474_v39  ;;  %v786_v47 = vmul.f32 %v778_v37, %v2466_v35  ;;  %v788_v34 = vmul.f32 %v779_v57, %v2466_v35  ;;  %v2249_v57 = vld [vmem:[%s4507_s4] ss:$12 sps:$4 sm:$0xff]  }
 0x24f   : > { %1084 = vmatpush2.bf16.msra.mxu1 %v916_v33  ;;  %vm4646_vm13 = vcmp.lt.s32.totalorder %v2414_v9, 111  ;;  %v4656_v16 = vpack.c.bf16 %v4654_v23, %v4655_v43 }
 0x250   : > { %v863_v40 = vpop.permute.xlu1 %862  ;;  %1085 = vmatprep.subr.bf16.mxu1 %v915_v46  ;;  %v777_v12 = vpop.permute.xlu0 %776  ;;  %v911_v13 = vpack.c.bf16 %v789_v15, %v787_v14  ;;  %v910_v52 = vpack.c.bf16 %v788_v34, %v786_v47  ;;  %vm4647_vm14 = vmmov %vm4646_vm13  ;;  %v2256_v47 = vld [vmem:[%s4507_s4 + $0x20] ss:$12 sps:$4 sm:$0xff]   ;;  %v2259_v34 = vld [vmem:[%s4507_s4 + $0x30] ss:$12 sps:$4 sm:$0xff]  }
 0x251   : > { %v781_v55 = vsel %vm4639_vm0, %v2947_v7, %v777_v12  ;;  %v785_v42 = vsel %vm4645_vm3, %v777_v12, %v2947_v7  ;;  %vm4649_vm10 = vmmov %vm4646_vm13 }
 0x252   : > { %v792_v63 = vmul.f32 %v781_v55, %v2466_v35  ;;  %v793_v8 = vmul.f32 %v785_v42, %v2474_v39  ;;  %vm4650_vm11 = vmmov %vm4649_vm10  ;;  %v4664_v55 = vld [vmem:[#allocation12_spill] sm:$0xff]  ;;  %v4665_v42 = vld [vmem:[#allocation10_spill] sm:$0xff] }
 0x253   : > { %1086 = vmatpush2.bf16.msra.mxu1 %v914_v21  ;;  %vm4652_vm0 = vmmov %vm4649_vm10  ;;  %v4666_v14 = vpack.c.bf16 %v4664_v55, %v4665_v42 }
 0x254   : > { %v871_v62 = vpop.permute.xlu1 %870  ;;  %v865_v48 = vpop.permute.xlu0 %864  ;;  %v913_v56 = vpack.c.bf16 %v793_v8, %v791_v54  ;;  %v912_v20 = vpack.c.bf16 %v792_v63, %v790_v31  ;;  %vm4662_vm3 = vmmov %vm4652_vm0  ;;  %v2253_v63 = vld [vmem:[%s4507_s4 + $0x1c] ss:$12 sps:$4 sm:$0xff]  }
 0x255   : > { %v876_v49 = vsel %vm4646_vm13, %v863_v40, %v871_v62  ;;  %v880_v36 = vsel %vm4647_vm14, %v871_v62, %v863_v40  ;;  %vm4663_vm13 = vmmov %vm4652_vm0  ;;  %v2252_v62 = vld [vmem:[%s4507_s4 + $0x8] ss:$12 sps:$4 sm:$0xff]  }
 0x256   : > { %1087 = vmatprep.subr.bf16.mxu1 %v913_v56  ;;  %v886_v45 = vmul.f32 %v2438_v17, %v876_v49  ;;  %v887_v53 = vmul.f32 %v4651_v38, %v880_v36  ;;  %v4668_v56 = vmov 0  }
 0x257   : > { %1088 = vmatpush2.bf16.msra.mxu1 %v912_v20  ;;  %v2257_v20 = vld [vmem:[%s4507_s4 + $0x34] ss:$12 sps:$4 sm:$0xff]  }
 0x258   : > { %v859_v7 = vpop.permute.xlu1 %858  ;;  %1089 = vmatprep.subr.bf16.mxu1 %v911_v13  ;;  %v861_v4 = vpop.permute.xlu0 %860  ;;  %v2261_v13 = vld [vmem:[%s4507_s4 + $0x4c] ss:$12 sps:$4 sm:$0xff]  }
 0x25b   : > { %1090 = vmatpush2.bf16.msra.mxu1 %v910_v52  ;;  %v2264_v52 = vld [vmem:[%s4507_s4 + $0x50] ss:$12 sps:$4 sm:$0xff]  }
 0x25c   : > { %v867_v50 = vpop.permute.xlu1 %866  ;;  %2202 = vmatprep.subr.msk.bf16.mxu1 %vm2631_vm4, %v4648_v0  ;;  %v873_v1 = vpop.permute.xlu0 %872  ;;  %vm4653_vm4 = vmmov %vm4652_vm0 }
 0x25d   : > { %v877_v2 = vsel %vm4649_vm10, %v865_v48, %v873_v1  ;;  %v881_v11 = vsel %vm4650_vm11, %v873_v1, %v865_v48  ;;  %v874_v10 = vsel %vm4652_vm0, %v859_v7, %v867_v50  ;;  %v878_v19 = vsel %vm4653_vm4, %v867_v50, %v859_v7  ;;  %v2255_v48 = vld [vmem:[%s4507_s4 + $0x18] ss:$12 sps:$4 sm:$0xff]  }
 0x25e   : > { %v888_v5 = vmul.f32 %v2438_v17, %v877_v2  ;;  %v889_v44 = vmul.f32 %v4651_v38, %v881_v11  ;;  %v882_v40 = vmul.f32 %v2438_v17, %v874_v10  ;;  %v883_v12 = vmul.f32 %v4651_v38, %v878_v19  ;;  %v2260_v7 = vld [vmem:[%s4507_s4 + $0x38] ss:$12 sps:$4 sm:$0xff]  }
 0x25f   : > { %2205 = vmatpush2.bf16.msk.msra.mxu1 %vm2615_vm9, %v4656_v16  ;;  %vm1050_vm9 = vcmask 261120  }
 0x260   : > { %v924_v33 = vpack.c.bf16 %v888_v5, %v886_v45  ;;  %2208 = vmatprep.subr.msk.bf16.mxu1 %vm2591_vm15, %v4660_v3  ;;  %v869_v51 = vpop.permute.xlu0 %868  ;;  %v925_v6 = vpack.c.bf16 %v889_v44, %v887_v53 }
 0x261   : > { %v875_v31 = vsel %vm4662_vm3, %v861_v4, %v869_v51  ;;  %v879_v54 = vsel %vm4663_vm13, %v869_v51, %v861_v4  ;;  %v2263_v4 = vld [vmem:[%s4507_s4 + $0x48] ss:$12 sps:$4 sm:$0xff]  }
 0x262   : > { %v884_v21 = vmul.f32 %v2438_v17, %v875_v31  ;;  %v885_v37 = vmul.f32 %v4651_v38, %v879_v54  ;;  %1148 = vmatprep.subr.bf16.mxu0 %v925_v6 }
 0x263   : > { %2211 = vmatpush2.bf16.msk.msra.mxu1 %vm2575_vm12, %v4666_v14  ;;  %1149 = vmatpush1.bf16.msra.mxu0 %v924_v33  ;;  %vm4709_vm12 = vcmp.lt.s32.totalorder %v2414_v9, 127 }
 0x264   : > { %v922_v8 = vpack.c.bf16 %v884_v21, %v882_v40  ;;  %v923_v17 = vpack.c.bf16 %v885_v37, %v883_v12  ;;  %vm4710_vm15 = vmmov %vm4709_vm12 }
 0x265   : > { %vm4711_vm14 = vmmov %vm4709_vm12 }
 0x266   : > { %1096 = vmatmul.mubr.bf16.vlgmr.msra.gmra.mxu1 %v2249_v57  ;;  %1150 = vmatprep.subr.bf16.mxu0 %v923_v17  ;;  %vm4712_vm10 = vmmov %vm4709_vm12 }
 0x267   : > { %1151 = vmatpush1.bf16.msra.mxu0 %v922_v8  ;;  %1105 = vmatprep.mubr.bf16.mxu1 %v2253_v63  ;;  %vm4739_vm11 = vmmov %vm4712_vm10 }
 0x268   : > { %vm4740_vm0 = vmmov %vm4712_vm10 }
 0x269   : > { %v3130_v49 = vpop.permute.xlu1 %982  ;;  %vm4742_vm4 = vmmov %vm4740_vm0 }
 0x26a   : > { %2212 = vmatmul.mubr.msk.bf16.vlgmr.msra.gmra.mxu0 %vm1050_vm9, %v2252_v62  ;;  %vm4743_vm3 = vmmov %vm4740_vm0 }
 0x26b   : > { %1178 = vmatprep.mubr.bf16.mxu0 %v4668_v56  ;;  %vm4744_vm13 = vmmov %vm4740_vm0 }
 0x26d   : > { %v3132_v36 = vpop.permute.xlu0 %987  ;;  %v3134_v50 = vpop.permute.xlu1 %972 }
 0x26e   : > { %1106 = vmatmul.mubr.bf16.gmra.mxu1 %v2255_v48 }
 0x26f   : > { %1115 = vmatprep.mubr.bf16.mxu1 %v2257_v20 }
 0x271   : > { %v3136_v0 = vpop.permute.xlu0 %977  ;;  %v3138_v1 = vpop.permute.xlu1 %962 }
 0x272   : > { %2213 = vmatmul.mubr.msk.bf16.gmra.mxu0 %vm1050_vm9, %v2256_v47 }
 0x273   : > { %1188 = vmatprep.mubr.bf16.mxu0 %v4668_v56 }
 0x275   : > { %v3140_v2 = vpop.permute.xlu0 %967  ;;  %v953_v45 = vpop.permute.xlu1 %952 }
 0x276   : > { %1116 = vmatmul.mubr.bf16.gmra.mxu1 %v2259_v34 }
 0x277   : > { %1125 = vmatprep.mubr.bf16.mxu1 %v2261_v13 }
 0x279   : > { %v958_v19 = vpop.permute.xlu0 %957 }
 0x27a   : > { %2214 = vmatmul.mubr.msk.bf16.gmra.mxu0 %vm1050_vm9, %v2260_v7 }
 0x27b   : > { %1198 = vmatprep.mubr.bf16.mxu0 %v4668_v56 }
 0x27e   : > { %1126 = vmatmul.mubr.bf16.gmra.mxu1 %v2263_v4 }
 0x282   : > { %2215 = vmatmul.mubr.msk.bf16.gmra.mxu0 %vm1050_vm9, %v2264_v52  ;;  %vm4745_vm9 = vmmov %vm4740_vm0 }
 0x326   : > { %v1097_v11 = vpop.f32.mrf.mxu1 }
 0x327   : > { %v1098_v53 = vadd.f32 %v1097_v11, %v953_v45 }
 0x328   : > { %v1099_v38 = vpop.f32.mrf.mxu1 }
 0x329   : > { %v1100_v30 = vadd.f32 %v1099_v38, %v953_v45 }
 0x32a   : > { %v1101_v5 = vpop.f32.mrf.mxu1  ;;  %v1170_v44 = vpop.f32.mrf.mxu0 }
 0x32b   : > { %v1171_v10 = vadd.f32 %v1170_v44, %v1098_v53  ;;  %v1102_v43 = vadd.f32 %v1101_v5, %v958_v19 }
 0x32c   : > { %v1172_v23 = vpop.f32.mrf.mxu0  ;;  %v1103_v3 = vpop.f32.mrf.mxu1 }
 0x32d   : > { %v3142_v16 = vmax.f32 %v1171_v10, 0.0  ;;  %v1173_v46 = vadd.f32 %v1172_v23, %v1100_v30  ;;  %v1104_v6 = vadd.f32 %v1103_v3, %v958_v19 }
 0x32e   : > { %v1174_v32 = vpop.f32.mrf.mxu0  ;;  %v1107_v12 = vpop.f32.mrf.mxu1 }
 0x32f   : > { %v1175_v33 = vadd.f32 %v1174_v32, %v1102_v43  ;;  %1289 = vrot.lane.b32.xlu1 %v3142_v16, %s2288_s26  ;;  %v3168_v31 = vmax.f32 %v1173_v46, 0.0  ;;  %v1108_v55 = vadd.f32 %v1107_v12, %v3138_v1 }
 0x330   : > { %v1176_v51 = vpop.f32.mrf.mxu0  ;;  %v1109_v37 = vpop.f32.mrf.mxu1 }
 0x331   : > { %v3146_v41 = vmax.f32 %v1175_v33, 0.0  ;;  %v1177_v54 = vadd.f32 %v1176_v51, %v1104_v6  ;;  %v1110_v48 = vadd.f32 %v1109_v37, %v3138_v1 }
 0x332   : > { %v1180_v21 = vpop.f32.mrf.mxu0  ;;  %v1111_v42 = vpop.f32.mrf.mxu1 }
 0x333   : > { %1481 = vrot.lane.b32.xlu1 %v3142_v16, %s2283_s22  ;;  %1291 = vrot.lane.b32.xlu0 %v3146_v41, %s2288_s26  ;;  %v3174_v40 = vmax.f32 %v1177_v54, 0.0  ;;  %v1181_v14 = vadd.f32 %v1180_v21, %v1108_v55  ;;  %v1112_v63 = vadd.f32 %v1111_v42, %v3140_v2 }
 0x334   : > { %v1182_v57 = vpop.f32.mrf.mxu0  ;;  %v1113_v20 = vpop.f32.mrf.mxu1 }
 0x335   : > { %v3198_v8 = vmax.f32 %v1181_v14, 0.0  ;;  %v1183_v47 = vadd.f32 %v1182_v57, %v1110_v48  ;;  %v1114_v13 = vadd.f32 %v1113_v20, %v3140_v2 }
 0x336   : > { %v1184_v15 = vpop.f32.mrf.mxu0  ;;  %v1117_v1 = vpop.f32.mrf.mxu1 }
 0x337   : > { %1225 = vrot.lane.b32.xlu1 %v3142_v16, %s2287_s25  ;;  %1483 = vrot.lane.b32.xlu0 %v3146_v41, %s2283_s22  ;;  %v1185_v17 = vadd.f32 %v1184_v15, %v1112_v63  ;;  %v3228_v7 = vmax.f32 %v1183_v47, 0.0  ;;  %v1118_v38 = vadd.f32 %v1117_v1, %v3134_v50 }
 0x338   : > { %v1186_v34 = vpop.f32.mrf.mxu0  ;;  %v1119_v11 = vpop.f32.mrf.mxu1 }
 0x339   : > { %v3204_v62 = vmax.f32 %v1185_v17, 0.0  ;;  %v1187_v4 = vadd.f32 %v1186_v34, %v1114_v13  ;;  %v1120_v32 = vadd.f32 %v1119_v11, %v3134_v50 }
 0x33a   : > { %v1190_v2 = vpop.f32.mrf.mxu0  ;;  %v1121_v53 = vpop.f32.mrf.mxu1 }
 0x33b   : > { %1417 = vrot.lane.b32.xlu1 %v3142_v16, %s2285_s24  ;;  %1227 = vrot.lane.b32.xlu0 %v3146_v41, %s2287_s25  ;;  %v3234_v52 = vmax.f32 %v1187_v4, 0.0  ;;  %v1191_v5 = vadd.f32 %v1190_v2, %v1118_v38  ;;  %v1122_v10 = vadd.f32 %v1121_v53, %v3136_v0 }
 0x33c   : > { %v1192_v45 = vpop.f32.mrf.mxu0  ;;  %v1123_v33 = vpop.f32.mrf.mxu1 }
 0x33d   : > { %v3258_v19 = vmax.f32 %v1191_v5, 0.0  ;;  %v1193_v30 = vadd.f32 %v1192_v45, %v1120_v32  ;;  %v1124_v51 = vadd.f32 %v1123_v33, %v3136_v0 }
 0x33e   : > { %v1194_v44 = vpop.f32.mrf.mxu0  ;;  %v1127_v42 = vpop.f32.mrf.mxu1 }
 0x33f   : > { %1609 = vrot.lane.b32.xlu1 %v3142_v16, %s2282_s21  ;;  %1419 = vrot.lane.b32.xlu0 %v3146_v41, %s2285_s24  ;;  %4669 = vst [vmem:[#allocation3_spill] sm:$0xff] %v3258_v19  ;;  %v1195_v23 = vadd.f32 %v1194_v44, %v1122_v10  ;;  %v3290_v50 = vmax.f32 %v1193_v30, 0.0  ;;  %v1128_v47 = vadd.f32 %v1127_v42, %v3130_v49 }
 0x340   : > { %v1196_v46 = vpop.f32.mrf.mxu0  ;;  %v1129_v17 = vpop.f32.mrf.mxu1 }
 0x341   : > { %v3264_v43 = vmax.f32 %v1195_v23, 0.0  ;;  %4671 = vst [vmem:[#allocation16_spill] sm:$0xff] %v3290_v50  ;;  %v1197_v6 = vadd.f32 %v1196_v46, %v1124_v51 }
 0x342   : > { %v1200_v63 = vpop.f32.mrf.mxu0  ;;  %v1131_v13 = vpop.f32.mrf.mxu1 }
 0x343   : > { %1353 = vrot.lane.b32.xlu1 %v3142_v16, %s2284_s23  ;;  %1611 = vrot.lane.b32.xlu0 %v3146_v41, %s2282_s21  ;;  %4670 = vst [vmem:[#allocation17_spill] sm:$0xff] %v3264_v43  ;;  %v3300_v0 = vmax.f32 %v1197_v6, 0.0  ;;  %v1201_v4 = vadd.f32 %v1200_v63, %v1128_v47  ;;  %v1132_v45 = vadd.f32 %v1131_v13, %v3132_v36 }
 0x344   : > { %v1202_v34 = vpop.f32.mrf.mxu0 }
 0x345   : > { %4672 = vst [vmem:[#allocation18_spill] sm:$0xff] %v3300_v0  ;;  %v3344_v38 = vmax.f32 %v1201_v4, 0.0 }
 0x346   : > { %v1204_v11 = vpop.f32.mrf.mxu0 }
 0x347   : > { %1305 = vrot.lane.b32.xlu1 %v3168_v31, %s2288_s26  ;;  %1355 = vrot.lane.b32.xlu0 %v3146_v41, %s2284_s23  ;;  %4681 = vst [vmem:[#allocation21_spill] sm:$0xff] %v3344_v38  ;;  %v1205_v44 = vadd.f32 %v1204_v11, %v1132_v45  ;;  %v1130_v11 = vadd.f32 %v1129_v17, %v3130_v49  ;;  %v1133_v45 = vpop.f32.mrf.mxu1 }
 0x348   : > { %v1206_v18 = vpop.f32.mrf.mxu0 }
 0x349   : > { %v3358_v32 = vmax.f32 %v1205_v44, 0.0  ;;  %v1203_v44 = vadd.f32 %v1202_v34, %v1130_v11 }
 0x34b   : > { %1497 = vrot.lane.b32.xlu1 %v3168_v31, %s2283_s22  ;;  %1307 = vrot.lane.b32.xlu0 %v3174_v40, %s2288_s26  ;;  %4683 = vst [vmem:[#allocation23_spill] sm:$0xff] %v3358_v32  ;;  %v3414_v49 = vmax.f32 %v1203_v44, 0.0 }
 0x34d   : > { %4692 = vst [vmem:[#allocation32_spill] sm:$0xff] %v3414_v49 }
 0x34f   : > { %1241 = vrot.lane.b32.xlu1 %v3168_v31, %s2287_s25  ;;  %1499 = vrot.lane.b32.xlu0 %v3174_v40, %s2283_s22 }
 0x353   : > { %1433 = vrot.lane.b32.xlu1 %v3168_v31, %s2285_s24  ;;  %1243 = vrot.lane.b32.xlu0 %v3174_v40, %s2287_s25 }
 0x357   : > { %1625 = vrot.lane.b32.xlu1 %v3168_v31, %s2282_s21  ;;  %1435 = vrot.lane.b32.xlu0 %v3174_v40, %s2285_s24 }
 0x35b   : > { %1369 = vrot.lane.b32.xlu1 %v3168_v31, %s2284_s23  ;;  %1627 = vrot.lane.b32.xlu0 %v3174_v40, %s2282_s21 }
 0x35f   : > { %1293 = vrot.lane.b32.xlu1 %v3198_v8, %s2288_s26  ;;  %1371 = vrot.lane.b32.xlu0 %v3174_v40, %s2284_s23 }
 0x363   : > { %1485 = vrot.lane.b32.xlu1 %v3198_v8, %s2283_s22  ;;  %1295 = vrot.lane.b32.xlu0 %v3204_v62, %s2288_s26 }
 0x367   : > { %1229 = vrot.lane.b32.xlu1 %v3198_v8, %s2287_s25  ;;  %1487 = vrot.lane.b32.xlu0 %v3204_v62, %s2283_s22 }
 0x36b   : > { %1421 = vrot.lane.b32.xlu1 %v3198_v8, %s2285_s24  ;;  %1231 = vrot.lane.b32.xlu0 %v3204_v62, %s2287_s25 }
 0x36f   : > { %1613 = vrot.lane.b32.xlu1 %v3198_v8, %s2282_s21  ;;  %1423 = vrot.lane.b32.xlu0 %v3204_v62, %s2285_s24 }
 0x373   : > { %1357 = vrot.lane.b32.xlu1 %v3198_v8, %s2284_s23  ;;  %1615 = vrot.lane.b32.xlu0 %v3204_v62, %s2282_s21 }
 0x377   : > { %1309 = vrot.lane.b32.xlu1 %v3228_v7, %s2288_s26  ;;  %1359 = vrot.lane.b32.xlu0 %v3204_v62, %s2284_s23 }
 0x37b   : > { %1501 = vrot.lane.b32.xlu1 %v3228_v7, %s2283_s22  ;;  %1311 = vrot.lane.b32.xlu0 %v3234_v52, %s2288_s26 }
 0x37f   : > { %1245 = vrot.lane.b32.xlu1 %v3228_v7, %s2287_s25  ;;  %1503 = vrot.lane.b32.xlu0 %v3234_v52, %s2283_s22 }
 0x383   : > { %1437 = vrot.lane.b32.xlu1 %v3228_v7, %s2285_s24  ;;  %1247 = vrot.lane.b32.xlu0 %v3234_v52, %s2287_s25 }
 0x387   : > { %1629 = vrot.lane.b32.xlu1 %v3228_v7, %s2282_s21  ;;  %1439 = vrot.lane.b32.xlu0 %v3234_v52, %s2285_s24 }
 0x38b   : > { %1373 = vrot.lane.b32.xlu1 %v3228_v7, %s2284_s23  ;;  %1631 = vrot.lane.b32.xlu0 %v3234_v52, %s2282_s21 }
 0x38f   : > { %1297 = vrot.lane.b32.xlu1 %v3258_v19, %s2288_s26  ;;  %1375 = vrot.lane.b32.xlu0 %v3234_v52, %s2284_s23 }
 0x393   : > { %1489 = vrot.lane.b32.xlu1 %v3258_v19, %s2283_s22  ;;  %1299 = vrot.lane.b32.xlu0 %v3264_v43, %s2288_s26 }
 0x397   : > { %1233 = vrot.lane.b32.xlu1 %v3258_v19, %s2287_s25  ;;  %1491 = vrot.lane.b32.xlu0 %v3264_v43, %s2283_s22 }
 0x39b   : > { %1425 = vrot.lane.b32.xlu1 %v3258_v19, %s2285_s24  ;;  %1235 = vrot.lane.b32.xlu0 %v3264_v43, %s2287_s25 }
 0x39f   : > { %1617 = vrot.lane.b32.xlu1 %v3258_v19, %s2282_s21  ;;  %1427 = vrot.lane.b32.xlu0 %v3264_v43, %s2285_s24 }
 0x3a1   : > { %v3283_v3 = vpop.permute.xlu1 %1289 }
 0x3a3   : > { %1361 = vrot.lane.b32.xlu1 %v3258_v19, %s2284_s23  ;;  %1619 = vrot.lane.b32.xlu0 %v3264_v43, %s2282_s21 }
 0x3a5   : > { %v3292_v54 = vpop.permute.xlu1 %1481  ;;  %v3294_v12 = vpop.permute.xlu0 %1291 }
 0x3a7   : > { %1313 = vrot.lane.b32.xlu1 %v3290_v50, %s2288_s26  ;;  %1363 = vrot.lane.b32.xlu0 %v3264_v43, %s2284_s23 }
 0x3a9   : > { %v3302_v21 = vpop.permute.xlu1 %1225  ;;  %v3304_v37 = vpop.permute.xlu0 %1483 }
 0x3aa   : > { %4673 = vst [vmem:[#allocation13_spill] sm:$0xff] %v3302_v21 }
 0x3ab   : > { %1505 = vrot.lane.b32.xlu1 %v3290_v50, %s2283_s22  ;;  %1315 = vrot.lane.b32.xlu0 %v3300_v0, %s2288_s26 }
 0x3ad   : > { %v3310_v57 = vpop.permute.xlu1 %1417  ;;  %v3312_v55 = vpop.permute.xlu0 %1227 }
 0x3ae   : > { %4674 = vst [vmem:[#allocation11_spill] sm:$0xff] %v3310_v57  ;;  %4675 = vst [vmem:[#allocation15_spill] sm:$0xff] %v3312_v55 }
 0x3af   : > { %1249 = vrot.lane.b32.xlu1 %v3290_v50, %s2287_s25  ;;  %1507 = vrot.lane.b32.xlu0 %v3300_v0, %s2283_s22 }
 0x3b1   : > { %v3318_v14 = vpop.permute.xlu1 %1609  ;;  %v3320_v15 = vpop.permute.xlu0 %1419 }
 0x3b2   : > { %4676 = vst [vmem:[#allocation12_spill] sm:$0xff] %v3318_v14  ;;  %4677 = vst [vmem:[#allocation10_spill] sm:$0xff] %v3320_v15 }
 0x3b3   : > { %1441 = vrot.lane.b32.xlu1 %v3290_v50, %s2285_s24  ;;  %1251 = vrot.lane.b32.xlu0 %v3300_v0, %s2287_s25 }
 0x3b5   : > { %v3326_v48 = vpop.permute.xlu1 %1353  ;;  %v3328_v20 = vpop.permute.xlu0 %1611 }
 0x3b6   : > { %4678 = vst [vmem:[#allocation14_spill] sm:$0xff] %v3326_v48  ;;  %4679 = vst [vmem:[#allocation19_spill] sm:$0xff] %v3328_v20 }
 0x3b7   : > { %1633 = vrot.lane.b32.xlu1 %v3290_v50, %s2282_s21  ;;  %1443 = vrot.lane.b32.xlu0 %v3300_v0, %s2285_s24 }
 0x3b9   : > { %v3335_v1 = vpop.permute.xlu1 %1305  ;;  %v3337_v2 = vpop.permute.xlu0 %1355 }
 0x3ba   : > { %4680 = vst [vmem:[#allocation20_spill] sm:$0xff] %v3337_v2  ;;  %v1134_v2 = vadd.f32 %v1133_v45, %v3132_v36 }
 0x3bb   : > { %1377 = vrot.lane.b32.xlu1 %v3290_v50, %s2284_s23  ;;  %1635 = vrot.lane.b32.xlu0 %v3300_v0, %s2282_s21 }
 0x3bc   : > { %v1207_v34 = vadd.f32 %v1206_v18, %v1134_v2 }
 0x3bd   : > { %v3346_v53 = vpop.permute.xlu1 %1497  ;;  %v3348_v5 = vpop.permute.xlu0 %1307 }
 0x3be   : > { %v3428_v36 = vmax.f32 %v1207_v34, 0.0 }
 0x3bf   : > { %1301 = vrot.lane.b32.xlu1 %v3344_v38, %s2288_s26  ;;  %1379 = vrot.lane.b32.xlu0 %v3300_v0, %s2284_s23 }
 0x3c0   : > { %4697 = vst [vmem:[#allocation37_spill] sm:$0xff] %v3428_v36 }
 0x3c1   : > { %v3354_v10 = vpop.permute.xlu1 %1241  ;;  %v3356_v23 = vpop.permute.xlu0 %1499 }
 0x3c2   : > { %4682 = vst [vmem:[#allocation22_spill] sm:$0xff] %v3354_v10 }
 0x3c3   : > { %1493 = vrot.lane.b32.xlu1 %v3344_v38, %s2283_s22  ;;  %1303 = vrot.lane.b32.xlu0 %v3358_v32, %s2288_s26 }
 0x3c5   : > { %v3364_v33 = vpop.permute.xlu1 %1433  ;;  %v3366_v30 = vpop.permute.xlu0 %1243 }
 0x3c6   : > { %4684 = vst [vmem:[#allocation24_spill] sm:$0xff] %v3364_v33  ;;  %4685 = vst [vmem:[#allocation25_spill] sm:$0xff] %v3366_v30 }
 0x3c7   : > { %1237 = vrot.lane.b32.xlu1 %v3344_v38, %s2287_s25  ;;  %1495 = vrot.lane.b32.xlu0 %v3358_v32, %s2283_s22 }
 0x3c9   : > { %v3372_v46 = vpop.permute.xlu1 %1625  ;;  %v3374_v51 = vpop.permute.xlu0 %1435 }
 0x3ca   : > { %4686 = vst [vmem:[#allocation26_spill] sm:$0xff] %v3372_v46  ;;  %4687 = vst [vmem:[#allocation27_spill] sm:$0xff] %v3374_v51 }
 0x3cb   : > { %1429 = vrot.lane.b32.xlu1 %v3344_v38, %s2285_s24  ;;  %1239 = vrot.lane.b32.xlu0 %v3358_v32, %s2287_s25 }
 0x3cd   : > { %v3380_v6 = vpop.permute.xlu1 %1369  ;;  %v3382_v42 = vpop.permute.xlu0 %1627 }
 0x3ce   : > { %4688 = vst [vmem:[#allocation28_spill] sm:$0xff] %v3380_v6  ;;  %4689 = vst [vmem:[#allocation29_spill] sm:$0xff] %v3382_v42 }
 0x3cf   : > { %1621 = vrot.lane.b32.xlu1 %v3344_v38, %s2282_s21  ;;  %1431 = vrot.lane.b32.xlu0 %v3358_v32, %s2285_s24 }
 0x3d1   : > { %v3388_v63 = vpop.permute.xlu1 %1293  ;;  %v3390_v47 = vpop.permute.xlu0 %1371 }
 0x3d2   : > { %4690 = vst [vmem:[#allocation30_spill] sm:$0xff] %v3390_v47 }
 0x3d3   : > { %1365 = vrot.lane.b32.xlu1 %v3344_v38, %s2284_s23  ;;  %1623 = vrot.lane.b32.xlu0 %v3358_v32, %s2282_s21 }
 0x3d5   : > { %v3396_v13 = vpop.permute.xlu1 %1485  ;;  %v3398_v4 = vpop.permute.xlu0 %1295 }
 0x3d7   : > { %1557 = vrot.lane.b32.xlu1 %v3344_v38, %s2280_s19  ;;  %1367 = vrot.lane.b32.xlu0 %v3358_v32, %s2284_s23 }
 0x3d9   : > { %v3405_v56 = vpop.permute.xlu1 %1229  ;;  %v3407_v22 = vpop.permute.xlu0 %1487 }
 0x3da   : > { %4691 = vst [vmem:[#allocation31_spill] sm:$0xff] %v3405_v56 }
 0x3db   : > { %1685 = vrot.lane.b32.xlu1 %v3344_v38, %s2281_s20  ;;  %1559 = vrot.lane.b32.xlu0 %v3358_v32, %s2280_s19  ;;  %v3527_v38 = vld [vmem:[%s4509_s6] sm:$0xff] }
 0x3dc   : > { %4708 = vst [vmem:[#allocation48_spill] sm:$0xff] %v3527_v38 }
 0x3dd   : > { %v3416_v17 = vpop.permute.xlu1 %1421  ;;  %v3418_v47 = vpop.permute.xlu0 %1231 }
 0x3de   : > { %4693 = vst [vmem:[#allocation33_spill] sm:$0xff] %v3416_v17  ;;  %4694 = vst [vmem:[#allocation34_spill] sm:$0xff] %v3418_v47 }
 0x3df   : > { %1317 = vrot.lane.b32.xlu1 %v3414_v49, %s2288_s26  ;;  %1687 = vrot.lane.b32.xlu0 %v3358_v32, %s2281_s20 }
 0x3e1   : > { %v3424_v11 = vpop.permute.xlu1 %1613  ;;  %v3426_v6 = vpop.permute.xlu0 %1423 }
 0x3e2   : > { %4695 = vst [vmem:[#allocation35_spill] sm:$0xff] %v3424_v11  ;;  %4696 = vst [vmem:[#allocation36_spill] sm:$0xff] %v3426_v6 }
 0x3e3   : > { %1553 = vrot.lane.b32.xlu1 %v3258_v19, %s2280_s19  ;;  %1319 = vrot.lane.b32.xlu0 %v3428_v36, %s2288_s26 }
 0x3e5   : > { %v3434_v45 = vpop.permute.xlu1 %1357  ;;  %v3436_v18 = vpop.permute.xlu0 %1615 }
 0x3e6   : > { %4698 = vst [vmem:[#allocation38_spill] sm:$0xff] %v3434_v45  ;;  %4699 = vst [vmem:[#allocation39_spill] sm:$0xff] %v3436_v18 }
 0x3e7   : > { %1509 = vrot.lane.b32.xlu1 %v3414_v49, %s2283_s22  ;;  %1555 = vrot.lane.b32.xlu0 %v3264_v43, %s2280_s19 }
 0x3e9   : > { %v3442_v2 = vpop.permute.xlu1 %1309  ;;  %v3444_v44 = vpop.permute.xlu0 %1359 }
 0x3ea   : > { %4700 = vst [vmem:[#allocation40_spill] sm:$0xff] %v3444_v44 }
 0x3eb   : > { %1253 = vrot.lane.b32.xlu1 %v3414_v49, %s2287_s25  ;;  %1571 = vrot.lane.b32.xlu0 %v3300_v0, %s2280_s19 }
 0x3ed   : > { %v3450_v34 = vpop.permute.xlu1 %1501  ;;  %v3452_v45 = vpop.permute.xlu0 %1311 }
 0x3ef   : > { %1445 = vrot.lane.b32.xlu1 %v3414_v49, %s2285_s24  ;;  %1511 = vrot.lane.b32.xlu0 %v3428_v36, %s2283_s22 }
 0x3f1   : > { %v3458_v18 = vpop.permute.xlu1 %1245  ;;  %v3460_v11 = vpop.permute.xlu0 %1503 }
 0x3f2   : > { %4701 = vst [vmem:[#allocation41_spill] sm:$0xff] %v3458_v18 }
 0x3f3   : > { %1637 = vrot.lane.b32.xlu1 %v3414_v49, %s2282_s21  ;;  %1255 = vrot.lane.b32.xlu0 %v3428_v36, %s2287_s25 }
 0x3f5   : > { %v3466_v44 = vpop.permute.xlu1 %1437  ;;  %v3468_v17 = vpop.permute.xlu0 %1247 }
 0x3f6   : > { %4702 = vst [vmem:[#allocation42_spill] sm:$0xff] %v3466_v44 }
 0x3f7   : > { %1381 = vrot.lane.b32.xlu1 %v3414_v49, %s2284_s23  ;;  %1683 = vrot.lane.b32.xlu0 %v3264_v43, %s2281_s20 }
 0x3f9   : > { %v3474_v48 = vpop.permute.xlu1 %1629  ;;  %v3476_v6 = vpop.permute.xlu0 %1439 }
 0x3fa   : > { %4703 = vst [vmem:[#allocation43_spill] sm:$0xff] %v3474_v48  ;;  %4704 = vst [vmem:[#allocation44_spill] sm:$0xff] %v3476_v6 }
 0x3fb   : > { %1573 = vrot.lane.b32.xlu1 %v3414_v49, %s2280_s19  ;;  %1699 = vrot.lane.b32.xlu0 %v3300_v0, %s2281_s20  ;;  %v2217_v0 = vcombine.high %v3527_v38, %v3527_v38 }
 0x3fd   : > { %v3482_v20 = vpop.permute.xlu1 %1373  ;;  %v3484_v44 = vpop.permute.xlu0 %1631  ;;  %1871 = vmatprep.mubr.bf16.mxu0 %v2217_v0 }
 0x3fe   : > { %4705 = vst [vmem:[#allocation45_spill] sm:$0xff] %v3482_v20  ;;  %4706 = vst [vmem:[#allocation46_spill] sm:$0xff] %v3484_v44 }
 0x3ff   : > { %1701 = vrot.lane.b32.xlu1 %v3414_v49, %s2281_s20  ;;  %1551 = vrot.lane.b32.xlu0 %v3204_v62, %s2280_s19 }
 0x401   : > { %v1298_v42 = vpop.permute.xlu1 %1297  ;;  %v3490_v48 = vpop.permute.xlu0 %1375 }
 0x402   : > { %4707 = vst [vmem:[#allocation47_spill] sm:$0xff] %v3490_v48 }
 0x403   : > { %1569 = vrot.lane.b32.xlu1 %v3290_v50, %s2280_s19  ;;  %1447 = vrot.lane.b32.xlu0 %v3428_v36, %s2285_s24 }
 0x405   : > { %v1490_v6 = vpop.permute.xlu1 %1489  ;;  %v1300_v14 = vpop.permute.xlu0 %1299 }
 0x407   : > { %1681 = vrot.lane.b32.xlu1 %v3258_v19, %s2281_s20  ;;  %1567 = vrot.lane.b32.xlu0 %v3234_v52, %s2280_s19 }
 0x409   : > { %v1234_v20 = vpop.permute.xlu1 %1233  ;;  %v1492_v44 = vpop.permute.xlu0 %1491 }
 0x40b   : > { %1697 = vrot.lane.b32.xlu1 %v3290_v50, %s2281_s20  ;;  %1679 = vrot.lane.b32.xlu0 %v3204_v62, %s2281_s20 }
 0x40d   : > { %v1426_v48 = vpop.permute.xlu1 %1425  ;;  %v1236_v46 = vpop.permute.xlu0 %1235 }
 0x40f   : > { %1549 = vrot.lane.b32.xlu1 %v3198_v8, %s2280_s19  ;;  %1639 = vrot.lane.b32.xlu0 %v3428_v36, %s2282_s21 }
 0x411   : > { %v3508_v49 = vpop.permute.xlu1 %1617  ;;  %v3510_v51 = vpop.permute.xlu0 %1427 }
 0x413   : > { %1565 = vrot.lane.b32.xlu1 %v3228_v7, %s2280_s19  ;;  %1383 = vrot.lane.b32.xlu0 %v3428_v36, %s2284_s23 }
 0x415   : > { %v3516_v15 = vpop.permute.xlu1 %1361  ;;  %v3518_v32 = vpop.permute.xlu0 %1619 }
 0x417   : > { %1677 = vrot.lane.b32.xlu1 %v3198_v8, %s2281_s20  ;;  %1695 = vrot.lane.b32.xlu0 %v3234_v52, %s2281_s20 }
 0x419   : > { %v1314_v33 = vpop.permute.xlu1 %1313  ;;  %v3529_v57 = vpop.permute.xlu0 %1363 }
 0x41a   : > { %v1325_v50 = vsel %vm388_vm8, %v1298_v42, %v1314_v33  ;;  %v1333_v43 = vsel %vm388_vm8, %v1314_v33, %v1298_v42 }
 0x41b   : > { %1693 = vrot.lane.b32.xlu1 %v3228_v7, %s2281_s20  ;;  %1547 = vrot.lane.b32.xlu0 %v3146_v41, %s2280_s19  ;;  %v3550_v30 = vmul.f32 %v1333_v43, %v2528_v28  ;;  %v3553_v33 = vmul.f32 %v1325_v50, %v2531_v29 }
 0x41d   : > { %v1506_v19 = vpop.permute.xlu1 %1505  ;;  %v1316_v21 = vpop.permute.xlu0 %1315 }
 0x41e   : > { %v1517_v10 = vsel %vm4709_vm12, %v1490_v6, %v1506_v19  ;;  %v1525_v38 = vsel %vm4710_vm15, %v1506_v19, %v1490_v6  ;;  %v1326_v0 = vsel %vm388_vm8, %v1300_v14, %v1316_v21  ;;  %v1334_v55 = vsel %vm388_vm8, %v1316_v21, %v1300_v14  ;;  %vm4746_vm12 = vmmov %vm4740_vm0 }
 0x41f   : > { %v3556_v42 = vmul.f32 %v1334_v55, %v2528_v28  ;;  %v3559_v56 = vmul.f32 %v1326_v0, %v2531_v29  ;;  %1545 = vrot.lane.b32.xlu1 %v3142_v16, %s2280_s19  ;;  %1575 = vrot.lane.b32.xlu0 %v3428_v36, %s2280_s19  ;;  %v3578_v18 = vmul.f32 %v1517_v10, %v2466_v35  ;;  %vm4747_vm15 = vmmov %vm4740_vm0 }
 0x420   : > { %v3581_v19 = vmul.f32 %v1525_v38, %v2474_v39 }
 0x421   : > { %v1250_v43 = vpop.permute.xlu1 %1249  ;;  %v1508_v21 = vpop.permute.xlu0 %1507  ;;  %4713 = vst [vmem:[#allocation49_spill] sm:$0xff] %v3578_v18 }
 0x422   : > { %v1261_v55 = vsel %vm371_vm7, %v1234_v20, %v1250_v43  ;;  %v1269_v14 = vsel %vm371_vm7, %v1250_v43, %v1234_v20  ;;  %v1518_v6 = vsel %vm4711_vm14, %v1492_v44, %v1508_v21  ;;  %v1526_v0 = vsel %vm4712_vm10, %v1508_v21, %v1492_v44  ;;  %v3600_v43 = vld [vmem:[%s4509_s6 + $0x8] sm:$0xff]  ;;  %vm4748_vm14 = vmmov %vm4740_vm0 }
 0x423   : > { %v3584_v50 = vmul.f32 %v1518_v6, %v2466_v35  ;;  %v3587_v47 = vmul.f32 %v1526_v0, %v2474_v39  ;;  %1561 = vrot.lane.b32.xlu1 %v3168_v31, %s2280_s19  ;;  %1703 = vrot.lane.b32.xlu0 %v3428_v36, %s2281_s20  ;;  %4715 = vst [vmem:[#allocation51_spill] sm:$0xff] %v3600_v43  ;;  %vm4750_vm10 = vmmov %vm4740_vm0 }
 0x424   : > { %v3611_v36 = vmul.f32 %v1269_v14, %v2522_v25  ;;  %v3614_v38 = vmul.f32 %v1261_v55, %v2525_v26 }
 0x425   : > { %4714 = vst [vmem:[#allocation50_spill] sm:$0xff] %v3584_v50  ;;  %v1442_v10 = vpop.permute.xlu1 %1441  ;;  %v1252_v44 = vpop.permute.xlu0 %1251 }
 0x426   : > { %v1453_v21 = vsel %vm422_vm6, %v1426_v48, %v1442_v10  ;;  %v1461_v6 = vsel %vm422_vm6, %v1442_v10, %v1426_v48  ;;  %v1262_v0 = vsel %vm371_vm7, %v1236_v46, %v1252_v44  ;;  %v1270_v20 = vsel %vm371_vm7, %v1252_v44, %v1236_v46  ;;  %4716 = vst [vmem:[#allocation52_spill] sm:$0xff] %v3611_v36 }
 0x427   : > { %v3617_v18 = vmul.f32 %v1270_v20, %v2522_v25  ;;  %v3620_v50 = vmul.f32 %v1262_v0, %v2525_v26  ;;  %1673 = vrot.lane.b32.xlu1 %v3142_v16, %s2281_s20  ;;  %1563 = vrot.lane.b32.xlu0 %v3174_v40, %s2280_s19  ;;  %v2219_v48 = vcombine.high %v3600_v43, %v3600_v43 }
 0x428   : > { %v3645_v43 = vmul.f32 %v1461_v6, %v2500_v60  ;;  %v3648_v20 = vmul.f32 %v1453_v21, %v2503_v61 }
 0x429   : > { %v1634_v55 = vpop.permute.xlu1 %1633  ;;  %v1444_v14 = vpop.permute.xlu0 %1443  ;;  %1912 = vmatprep.mubr.bf16.mxu1 %v2219_v48 }
 0x42a   : > { %v1645_v10 = vsel %vm473_vm2, %v3508_v49, %v1634_v55  ;;  %v1653_v44 = vsel %vm473_vm2, %v1634_v55, %v3508_v49  ;;  %v1454_v0 = vsel %vm422_vm6, %v3510_v51, %v1444_v14  ;;  %v1462_v46 = vsel %vm422_vm6, %v1444_v14, %v3510_v51  ;;  %4717 = vst [vmem:[#allocation53_spill] sm:$0xff] %v3645_v43  ;;  %v1812_v51 = vld [vmem:[%s4510_s7] sm:$0xff] }
 0x42b   : > { %4718 = vst [vmem:[#allocation54_spill] sm:$0xff] %v3648_v20  ;;  %v3651_v36 = vmul.f32 %v1462_v46, %v2500_v60  ;;  %v3654_v49 = vmul.f32 %v1454_v0, %v2503_v61  ;;  %1689 = vrot.lane.b32.xlu1 %v3168_v31, %s2281_s20  ;;  %1675 = vrot.lane.b32.xlu0 %v3146_v41, %s2281_s20 }
 0x42c   : > { %v3680_v43 = vmul.f32 %v1645_v10, %v2451_v24  ;;  %v3683_v46 = vmul.f32 %v1653_v44, %v2458_v27 }
 0x42d   : > { %4719 = vst [vmem:[#allocation55_spill] sm:$0xff] %v3651_v36  ;;  %4720 = vst [vmem:[#allocation56_spill] sm:$0xff] %v3654_v49  ;;  %v1378_v6 = vpop.permute.xlu1 %1377  ;;  %v1636_v48 = vpop.permute.xlu0 %1635 }
 0x42e   : > { %v1389_v55 = vsel %vm405_vm5, %v3516_v15, %v1378_v6  ;;  %v1397_v14 = vsel %vm405_vm5, %v1378_v6, %v3516_v15  ;;  %v1646_v0 = vsel %vm473_vm2, %v3518_v32, %v1636_v48  ;;  %v1654_v21 = vsel %vm473_vm2, %v1636_v48, %v3518_v32  ;;  %4721 = vst [vmem:[#allocation57_spill] sm:$0xff] %v3680_v43 }
 0x42f   : > { %4722 = vst [vmem:[#allocation58_spill] sm:$0xff] %v3683_v46  ;;  %v3686_v36 = vmul.f32 %v1646_v0, %v2451_v24  ;;  %v3689_v20 = vmul.f32 %v1654_v21, %v2458_v27  ;;  %1815 = vperm.xlu1 %2246, %v1812_v51   ;;  %1691 = vrot.lane.b32.xlu0 %v3174_v40, %s2281_s20 }
 0x430   : > { %v3704_v51 = vmul.f32 %v1397_v14, %v2494_v58  ;;  %v3707_v48 = vmul.f32 %v1389_v55, %v2497_v59 }
 0x431   : > { %4723 = vst [vmem:[#allocation59_spill] sm:$0xff] %v3686_v36  ;;  %4724 = vst [vmem:[#allocation60_spill] sm:$0xff] %v3689_v20  ;;  %v1302_v32 = vpop.permute.xlu1 %1301  ;;  %v1380_v6 = vpop.permute.xlu0 %1379 }
 0x432   : > { %v1390_v44 = vsel %vm405_vm5, %v3529_v57, %v1380_v6  ;;  %v1398_v21 = vsel %vm405_vm5, %v1380_v6, %v3529_v57  ;;  %4725 = vst [vmem:[#allocation61_spill] sm:$0xff] %v3704_v51  ;;  %4726 = vst [vmem:[#allocation62_spill] sm:$0xff] %v3707_v48 }
 0x433   : > { %v3710_v0 = vmul.f32 %v1398_v21, %v2494_v58  ;;  %v3713_v15 = vmul.f32 %v1390_v44, %v2497_v59 }
 0x435   : > { %4727 = vst [vmem:[#allocation63_spill] sm:$0xff] %v3710_v0  ;;  %4728 = vst [vmem:[#allocation64_spill] sm:$0xff] %v3713_v15  ;;  %v1494_v10 = vpop.permute.xlu1 %1493  ;;  %v1304_v36 = vpop.permute.xlu0 %1303 }
 0x439   : > { %v3719_v6 = vpop.permute.xlu1 %1237  ;;  %v1496_v14 = vpop.permute.xlu0 %1495 }
 0x43d   : > { %v3721_v46 = vpop.permute.xlu1 %1429  ;;  %v3723_v55 = vpop.permute.xlu0 %1239 }
 0x441   : > { %v3725_v21 = vpop.permute.xlu1 %1621  ;;  %v3727_v20 = vpop.permute.xlu0 %1431 }
 0x442   : > { %4729 = vst [vmem:[#allocation65_spill] sm:$0xff] %v3725_v21 }
 0x445   : > { %v3729_v44 = vpop.permute.xlu1 %1365  ;;  %v3731_v59 = vpop.permute.xlu0 %1623 }
 0x446   : > { %4730 = vst [vmem:[#allocation66_spill] sm:$0xff] %v3729_v44  ;;  %4731 = vst [vmem:[#allocation67_spill] sm:$0xff] %v3731_v59 }
 0x449   : > { %v3733_v43 = vpop.permute.xlu1 %1557  ;;  %v3735_v51 = vpop.permute.xlu0 %1367 }
 0x44a   : > { %4732 = vst [vmem:[#allocation68_spill] sm:$0xff] %v3733_v43  ;;  %4733 = vst [vmem:[#allocation69_spill] sm:$0xff] %v3735_v51 }
 0x44d   : > { %v3737_v57 = vpop.permute.xlu1 %1685  ;;  %v3739_v0 = vpop.permute.xlu0 %1559 }
 0x44e   : > { %4734 = vst [vmem:[#allocation70_spill] sm:$0xff] %v3737_v57  ;;  %4735 = vst [vmem:[#allocation71_spill] sm:$0xff] %v3739_v0 }
 0x451   : > { %v1318_v48 = vpop.permute.xlu1 %1317  ;;  %v3741_v15 = vpop.permute.xlu0 %1687 }
 0x452   : > { %4736 = vst [vmem:[#allocation72_spill] sm:$0xff] %v3741_v15  ;;  %v1327_v21 = vsel %vm388_vm8, %v1302_v32, %v1318_v48  ;;  %v1335_v58 = vsel %vm388_vm8, %v1318_v48, %v1302_v32  ;;  %v1324_v32 = vsel %vm388_vm8, %v3398_v4, %v3452_v45 }
 0x453   : > { %v1349_v0 = vmul.f32 %v1335_v58, %v2528_v28  ;;  %v1350_v51 = vmul.f32 %v1327_v21, %v2531_v29  ;;  %v1322_v58 = vsel %vm388_vm8, %v3294_v12, %v3348_v5  ;;  %v1330_v21 = vsel %vm388_vm8, %v3348_v5, %v3294_v12 }
 0x454   : > { %v1769_v12 = vpack.c.bf16 %v3146_v41, %v3142_v16  ;;  %v4808_v41 = vld [vmem:[#allocation69_spill] sm:$0xff] }
 0x455   : > { %v3747_v44 = vpop.permute.xlu1 %1553  ;;  %v1320_v59 = vpop.permute.xlu0 %1319 }
 0x456   : > { %4737 = vst [vmem:[#allocation73_spill] sm:$0xff] %v3747_v44  ;;  %v1328_v43 = vsel %vm388_vm8, %v1304_v36, %v1320_v59  ;;  %v1336_v57 = vsel %vm388_vm8, %v1320_v59, %v1304_v36  ;;  %v1323_v59 = vsel %vm388_vm8, %v3388_v63, %v3442_v2  ;;  %v1332_v36 = vsel %vm388_vm8, %v3452_v45, %v3398_v4 }
 0x457   : > { %v1351_v15 = vmul.f32 %v1336_v57, %v2528_v28  ;;  %v1352_v49 = vmul.f32 %v1328_v43, %v2531_v29  ;;  %v1344_v43 = vmul.f32 %v1324_v32, %v2531_v29  ;;  %v1342_v57 = vmul.f32 %v1323_v59, %v2531_v29 }
 0x458   : > { %v4738_v4 = vpack.c.bf16 %v3559_v56, %v3553_v33  ;;  %v1329_v45 = vsel %vm388_vm8, %v3335_v1, %v3283_v3 }
 0x459   : > { %v1510_v48 = vpop.permute.xlu1 %1509  ;;  %v1751_v44 = vpack.c.bf16 %v1351_v15, %v1349_v0  ;;  %v3761_v27 = vpop.permute.xlu0 %1555  ;;  %v1752_v24 = vpack.c.bf16 %v1352_v49, %v1350_v51  ;;  %v1321_v49 = vsel %vm388_vm8, %v3283_v3, %v3335_v1  ;;  %v1340_v51 = vmul.f32 %v1322_v58, %v2531_v29 }
 0x45a   : > { %v1331_v0 = vsel %vm388_vm8, %v3442_v2, %v3388_v63  ;;  %v1343_v63 = vmul.f32 %v1332_v36, %v2528_v28  ;;  %v1338_v2 = vmul.f32 %v1321_v49, %v2531_v29  ;;  %v1519_v33 = vsel %vm4739_vm11, %v1494_v10, %v1510_v48  ;;  %vm4752_vm11 = vmmov %vm4740_vm0 }
 0x45b   : > { %1839 = vmatprep.subr.bf16.mxu0 %v1752_v24  ;;  %v1341_v56 = vmul.f32 %v1331_v0, %v2528_v28  ;;  %v1527_v32 = vsel %vm4740_vm0, %v1510_v48, %v1494_v10  ;;  %v4741_v3 = vpack.c.bf16 %v3556_v42, %v3550_v30  ;;  %v1337_v5 = vmul.f32 %v1329_v45, %v2528_v28 }
 0x45c   : > { %1840 = vmatpush1.bf16.msra.mxu0 %v1751_v44  ;;  %v1748_v44 = vpack.c.bf16 %v1344_v43, %v1342_v57  ;;  %v1339_v58 = vmul.f32 %v1330_v21, %v2528_v28  ;;  %v1746_v36 = vpack.c.bf16 %v1340_v51, %v1338_v2  ;;  %v1770_v43 = vpack.c.bf16 %v3174_v40, %v3168_v31 }
 0x45d   : > { %v1254_v15 = vpop.permute.xlu1 %1253  ;;  %1841 = vmatprep.subr.bf16.mxu0 %v4738_v4  ;;  %v3789_v24 = vpop.permute.xlu0 %1571  ;;  %v1747_v10 = vpack.c.bf16 %v1343_v63, %v1341_v56  ;;  %v1524_v30 = vsel %vm4742_vm4, %v3460_v11, %v3407_v22  ;;  %v1541_v49 = vmul.f32 %v1519_v33, %v2466_v35  ;;  %v1542_v0 = vmul.f32 %v1527_v32, %v2474_v39 }
 0x45e   : > { %v1263_v4 = vsel %vm371_vm7, %v3719_v6, %v1254_v15  ;;  %v1271_v45 = vsel %vm371_vm7, %v1254_v15, %v3719_v6  ;;  %v1771_v63 = vpack.c.bf16 %v3204_v62, %v3198_v8  ;;  %v1745_v2 = vpack.c.bf16 %v1339_v58, %v1337_v5 }
 0x45f   : > { %v1516_v6 = vsel %vm4746_vm12, %v3407_v22, %v3460_v11  ;;  %v1536_v15 = vmul.f32 %v1524_v30, %v2474_v39  ;;  %v1285_v58 = vmul.f32 %v1271_v45, %v2522_v25  ;;  %v1521_v22 = vsel %vm4747_vm15, %v3346_v53, %v3292_v54 }
 0x460   : > { %1842 = vmatpush1.bf16.msra.mxu0 %v4741_v3  ;;  %v1522_v11 = vsel %vm4748_vm14, %v3356_v23, %v3304_v37  ;;  %v1513_v45 = vsel %vm4752_vm11, %v3292_v54, %v3346_v53  ;;  %vm4823_vm4 = vcmp.lt.s32.totalorder %v2414_v9, 111 }
 0x461   : > { %v3809_v1 = vpop.permute.xlu1 %1445  ;;  %1843 = vmatprep.subr.bf16.mxu0 %v1748_v44  ;;  %v1512_v59 = vpop.permute.xlu0 %1511  ;;  %v1523_v44 = vsel %vm4745_vm9, %v3450_v34, %v3396_v13 }
 0x462   : > { %v1520_v42 = vsel %vm4743_vm3, %v1496_v14, %v1512_v59  ;;  %v1528_v48 = vsel %vm4744_vm13, %v1512_v59, %v1496_v14  ;;  %v1772_v14 = vpack.c.bf16 %v3234_v52, %v3228_v7  ;;  %v1286_v59 = vmul.f32 %v1263_v4, %v2525_v26  ;;  %v4795_v52 = vld [vmem:[#allocation9_spill] sm:$0xff]  ;;  %vm4827_vm3 = vmmov %vm4823_vm4 }
 0x463   : > { %v1543_v51 = vmul.f32 %v1520_v42, %v2466_v35  ;;  %v1544_v57 = vmul.f32 %v1528_v48, %v2474_v39  ;;  %v1515_v48 = vsel %vm4750_vm10, %v3396_v13, %v3450_v34  ;;  %v1514_v13 = vsel %vm4740_vm0, %v3304_v37, %v3356_v23  ;;  %v4753_v34 = vld [vmem:[#allocation41_spill] sm:$0xff]  ;;  %vm4828_vm13 = vmmov %vm4827_vm3 }
 0x464   : > { %1844 = vmatpush1.bf16.msra.mxu0 %v1747_v10  ;;  %v1530_v37 = vmul.f32 %v1521_v22, %v2474_v39  ;;  %v4755_v23 = vld [vmem:[#allocation25_spill] sm:$0xff]  ;;  %vm4832_vm9 = vmmov %vm4827_vm3 }
 0x465   : > { %v3835_v21 = vpop.permute.xlu1 %1637  ;;  %v1783_v56 = vpack.c.bf16 %v1543_v51, %v1541_v49  ;;  %1845 = vmatprep.subr.bf16.mxu0 %v1746_v36  ;;  %v1256_v33 = vpop.permute.xlu0 %1255  ;;  %v1784_v32 = vpack.c.bf16 %v1544_v57, %v1542_v0  ;;  %v1534_v49 = vmul.f32 %v1523_v44, %v2474_v39  ;;  %v4751_v51 = vpack.c.bf16 %v3587_v47, %v3581_v19  ;;  %vm4833_vm12 = vmmov %vm4827_vm3 }
 0x466   : > { %v1264_v3 = vsel %vm371_vm7, %v3723_v55, %v1256_v33  ;;  %v1272_v5 = vsel %vm371_vm7, %v1256_v33, %v3723_v55  ;;  %v4749_v55 = vld [vmem:[#allocation34_spill] sm:$0xff]  ;;  %v1535_v47 = vmul.f32 %v1516_v6, %v2466_v35  ;;  %v1532_v19 = vmul.f32 %v1522_v11, %v2474_v39  ;;  %v4756_v33 = vld [vmem:[#allocation15_spill] sm:$0xff]  ;;  %vm4835_vm15 = vmmov %vm4827_vm3 }
 0x467   : > { %v1287_v36 = vmul.f32 %v1272_v5, %v2522_v25  ;;  %v1288_v10 = vmul.f32 %v1264_v3, %v2525_v26  ;;  %1880 = vmatprep.subr.bf16.mxu1 %v1784_v32  ;;  %v1260_v30 = vsel %vm371_vm7, %v4749_v55, %v3468_v17  ;;  %v1780_v53 = vpack.c.bf16 %v1536_v15, %v1534_v49  ;;  %v4757_v3 = vld [vmem:[#allocation50_spill] sm:$0xff]  ;;  %v4758_v5 = vld [vmem:[#allocation49_spill] sm:$0xff]  ;;  %vm4837_vm14 = vmmov %vm4827_vm3 }
 0x468   : > { %1846 = vmatpush1.bf16.msra.mxu0 %v1745_v2  ;;  %1881 = vmatpush1.bf16.msra.mxu1 %v1783_v56  ;;  %v4754_v2 = vld [vmem:[#allocation31_spill] sm:$0xff]  ;;  %v1268_v56 = vsel %vm371_vm7, %v3468_v17, %v4749_v55  ;;  %v1280_v54 = vmul.f32 %v1260_v30, %v2525_v26  ;;  %v1258_v32 = vsel %vm371_vm7, %v4756_v33, %v4755_v23  ;;  %v4760_v17 = vld [vmem:[#allocation22_spill] sm:$0xff]  ;;  %vm4838_vm10 = vmmov %vm4827_vm3 }
 0x469   : > { %v3872_v42 = vpop.permute.xlu1 %1381  ;;  %v1743_v0 = vpack.c.bf16 %v1287_v36, %v1285_v58  ;;  %1882 = vmatprep.subr.bf16.mxu1 %v4751_v51  ;;  %v3882_v57 = vpop.permute.xlu0 %1683  ;;  %v1744_v4 = vpack.c.bf16 %v1288_v10, %v1286_v59  ;;  %v1259_v44 = vsel %vm371_vm7, %v4754_v2, %v4753_v34  ;;  %v1533_v6 = vmul.f32 %v1515_v48, %v2466_v35  ;;  %v4761_v36 = vld [vmem:[#allocation13_spill] sm:$0xff]  ;;  %vm4839_vm11 = vmmov %vm4827_vm3 }
 0x46a   : > { %v4759_v58 = vpack.c.bf16 %v4757_v3, %v4758_v5  ;;  %v1257_v15 = vsel %vm371_vm7, %v4761_v36, %v4760_v17  ;;  %v1267_v10 = vsel %vm371_vm7, %v4753_v34, %v4754_v2  ;;  %v1278_v22 = vmul.f32 %v1259_v44, %v2525_v26  ;;  %v4763_v2 = vld [vmem:[#allocation3_spill] sm:$0xff]  ;;  %v4770_v5 = vld [vmem:[#allocation24_spill] sm:$0xff]  ;;  %vm4840_vm0 = vmmov %vm4827_vm3 }
 0x46b   : > { %1847 = vmatprep.subr.bf16.mxu0 %v1744_v4  ;;  %v4762_v11 = vpack.c.bf16 %v3620_v50, %v3614_v38  ;;  %v1531_v30 = vmul.f32 %v1514_v13, %v2466_v35  ;;  %v1266_v48 = vsel %vm371_vm7, %v4755_v23, %v4756_v33  ;;  %v1779_v49 = vpack.c.bf16 %v1535_v47, %v1533_v6  ;;  %v4764_v50 = vld [vmem:[#allocation17_spill] sm:$0xff]  ;;  %v4765_v47 = vld [vmem:[#allocation52_spill] sm:$0xff]  ;;  %v4768_v33 = vld [vmem:[#allocation18_spill] sm:$0xff] }
 0x46c   : > { %1848 = vmatpush1.bf16.msra.mxu0 %v1743_v0  ;;  %1883 = vmatpush1.bf16.msra.mxu1 %v4759_v58  ;;  %v1279_v0 = vmul.f32 %v1268_v56, %v2522_v25  ;;  %v1276_v51 = vmul.f32 %v1258_v32, %v2525_v26  ;;  %v1740_v4 = vpack.c.bf16 %v1280_v54, %v1278_v22  ;;  %v4769_v3 = vld [vmem:[#allocation11_spill] sm:$0xff]  ;;  %v4773_v22 = vld [vmem:[#allocation10_spill] sm:$0xff] }
 0x46d   : > { %v3912_v59 = vpop.permute.xlu1 %1573  ;;  %1849 = vmatprep.subr.bf16.mxu0 %v4762_v11  ;;  %1884 = vmatprep.subr.bf16.mxu1 %v1780_v53  ;;  %v3926_v55 = vpop.permute.xlu0 %1699  ;;  %v1778_v34 = vpack.c.bf16 %v1532_v19, %v1530_v37  ;;  %v1773_v38 = vpack.c.bf16 %v4764_v50, %v4763_v2  ;;  %v1529_v44 = vmul.f32 %v1513_v45, %v2466_v35  ;;  %v4767_v37 = vld [vmem:[#allocation16_spill] sm:$0xff]  ;;  %v4774_v11 = vld [vmem:[#allocation27_spill] sm:$0xff] }
 0x46e   : > { %v1265_v13 = vsel %vm371_vm7, %v4760_v17, %v4761_v36  ;;  %v1277_v53 = vmul.f32 %v1267_v10, %v2522_v25  ;;  %v4766_v23 = vpack.c.bf16 %v3617_v18, %v4765_v47  ;;  %v1274_v19 = vmul.f32 %v1257_v15, %v2525_v26  ;;  %v4771_v17 = vld [vmem:[#allocation21_spill] sm:$0xff]  ;;  %v4772_v36 = vld [vmem:[#allocation23_spill] sm:$0xff]  ;;  %v4792_v50 = vld [vmem:[#allocation8_spill] sm:$0xff] }
 0x46f   : > { %v1275_v54 = vmul.f32 %v1266_v48, %v2522_v25  ;;  %v1774_v32 = vpack.c.bf16 %v4768_v33, %v4767_v37  ;;  %v1777_v6 = vpack.c.bf16 %v1531_v30, %v1529_v44  ;;  %v1457_v18 = vsel %vm422_vm6, %v4770_v5, %v4769_v3 }
 0x470   : > { %1850 = vmatpush1.bf16.msra.mxu0 %v4766_v23  ;;  %1885 = vmatpush1.bf16.msra.mxu1 %v1779_v49  ;;  %v1739_v58 = vpack.c.bf16 %v1279_v0, %v1277_v53  ;;  %v1775_v10 = vpack.c.bf16 %v4772_v36, %v4771_v17  ;;  %v1273_v15 = vmul.f32 %v1265_v13, %v2522_v25  ;;  %v4777_v23 = vld [vmem:[#allocation26_spill] sm:$0xff]  ;;  %v4779_v17 = vld [vmem:[#allocation29_spill] sm:$0xff]  ;;  %v4780_v36 = vld [vmem:[#allocation19_spill] sm:$0xff] }
 0x471   : > { %v3946_v56 = vpop.permute.xlu1 %1701  ;;  %1851 = vmatprep.subr.bf16.mxu0 %v1740_v4  ;;  %1886 = vmatprep.subr.bf16.mxu1 %v1778_v34  ;;  %v3950_v45 = vpop.permute.xlu0 %1551  ;;  %v1458_v48 = vsel %vm422_vm6, %v4774_v11, %v4773_v22  ;;  %v1738_v49 = vpack.c.bf16 %v1276_v51, %v1274_v19  ;;  %v4775_v4 = vld [vmem:[#allocation32_spill] sm:$0xff]  ;;  %v4776_v34 = vld [vmem:[#allocation37_spill] sm:$0xff]  ;;  %v1449_v44 = vsel %vm422_vm6, %v4769_v3, %v4770_v5 }
 0x472   : > { %v1776_v30 = vpack.c.bf16 %v4776_v34, %v4775_v4  ;;  %v1455_v0 = vsel %vm422_vm6, %v3721_v46, %v3809_v1  ;;  %v1463_v13 = vsel %vm422_vm6, %v3809_v1, %v3721_v46  ;;  %v3982_v53 = vmul.f32 %v1457_v18, %v2500_v60  ;;  %v4778_v19 = vld [vmem:[#allocation12_spill] sm:$0xff] }
 0x473   : > { %v1737_v47 = vpack.c.bf16 %v1275_v54, %v1273_v15  ;;  %v1641_v37 = vsel %vm473_vm2, %v4778_v19, %v4777_v23  ;;  %v1450_v46 = vsel %vm422_vm6, %v4773_v22, %v4774_v11  ;;  %v3993_v1 = vmul.f32 %v1458_v48, %v2500_v60  ;;  %v4781_v11 = vld [vmem:[#allocation44_spill] sm:$0xff] }
 0x474   : > { %1852 = vmatpush1.bf16.msra.mxu0 %v1739_v58  ;;  %1887 = vmatpush1.bf16.msra.mxu1 %v1777_v6  ;;  %v1477_v3 = vmul.f32 %v1463_v13, %v2500_v60  ;;  %v1478_v5 = vmul.f32 %v1455_v0, %v2503_v61  ;;  %v1642_v15 = vsel %vm473_vm2, %v4780_v36, %v4779_v17 }
 0x475   : > { %v3979_v51 = vpop.permute.xlu1 %1569  ;;  %1853 = vmatprep.subr.bf16.mxu0 %v1738_v49  ;;  %1888 = vmatprep.subr.bf16.mxu1 %v1776_v30  ;;  %v1448_v33 = vpop.permute.xlu0 %1447  ;;  %v1650_v22 = vsel %vm473_vm2, %v4779_v17, %v4780_v36  ;;  %v1649_v4 = vsel %vm473_vm2, %v4777_v23, %v4778_v19  ;;  %v4024_v34 = vmul.f32 %v1450_v46, %v2503_v61  ;;  %v4786_v36 = vld [vmem:[#allocation42_spill] sm:$0xff]  ;;  %v4787_v23 = vld [vmem:[#allocation33_spill] sm:$0xff]  ;;  %v4788_v46 = vld [vmem:[#allocation7_spill] sm:$0xff] }
 0x476   : > { %v1456_v54 = vsel %vm422_vm6, %v3727_v20, %v1448_v33  ;;  %v1464_v6 = vsel %vm422_vm6, %v1448_v33, %v3727_v20  ;;  %v4782_v20 = vld [vmem:[#allocation36_spill] sm:$0xff]  ;;  %v1466_v33 = vmul.f32 %v1449_v44, %v2503_v61  ;;  %v1451_v19 = vsel %vm422_vm6, %v4787_v23, %v4786_v36 }
 0x477   : > { %v1479_v18 = vmul.f32 %v1464_v6, %v2500_v60  ;;  %v1480_v58 = vmul.f32 %v1456_v54, %v2503_v61  ;;  %v1452_v48 = vsel %vm422_vm6, %v4782_v20, %v4781_v11  ;;  %v4783_v54 = vld [vmem:[#allocation6_spill] sm:$0xff]  ;;  %v4785_v6 = vld [vmem:[#allocation28_spill] sm:$0xff]  ;;  %v1460_v44 = vsel %vm422_vm6, %v4781_v11, %v4782_v20 }
 0x478   : > { %1854 = vmatpush1.bf16.msra.mxu0 %v1737_v47  ;;  %1889 = vmatpush1.bf16.msra.mxu1 %v1775_v10  ;;  %v4030_v47 = vmul.f32 %v1641_v37, %v4783_v54  ;;  %v4784_v10 = vld [vmem:[#allocation14_spill] sm:$0xff]  ;;  %v1472_v37 = vmul.f32 %v1452_v48, %v2503_v61  ;;  %v1470_v11 = vmul.f32 %v1451_v19, %v2503_v61  ;;  %v4789_v20 = vld [vmem:[#allocation56_spill] sm:$0xff]  ;;  %v4796_v19 = vld [vmem:[#allocation65_spill] sm:$0xff] }
 0x479   : > { %v4017_v49 = vpop.permute.xlu1 %1681  ;;  %v1767_v30 = vpack.c.bf16 %v1479_v18, %v1477_v3  ;;  %1890 = vmatprep.subr.bf16.mxu1 %v1774_v32  ;;  %v4026_v0 = vpop.permute.xlu0 %1567  ;;  %v1768_v13 = vpack.c.bf16 %v1480_v58, %v1478_v5  ;;  %v1393_v17 = vsel %vm405_vm5, %v4785_v6, %v4784_v10  ;;  %v4041_v32 = vmul.f32 %v1642_v15, %v4783_v54  ;;  %v4790_v48 = vld [vmem:[#allocation54_spill] sm:$0xff] }
 0x47a   : > { %v4044_v3 = vmul.f32 %v1650_v22, %v4788_v46  ;;  %v4052_v5 = vmul.f32 %v1649_v4, %v4788_v46  ;;  %v1761_v18 = vpack.c.bf16 %v3993_v1, %v3982_v53  ;;  %v1385_v58 = vsel %vm405_vm5, %v4784_v10, %v4785_v6  ;;  %v4794_v10 = vld [vmem:[#allocation20_spill] sm:$0xff] }
 0x47b   : > { %1855 = vmatprep.subr.bf16.mxu0 %v1768_v13  ;;  %v1459_v22 = vsel %vm422_vm6, %v4786_v36, %v4787_v23  ;;  %v4791_v4 = vpack.c.bf16 %v4789_v20, %v4790_v48  ;;  %v1762_v2 = vpack.c.bf16 %v4024_v34, %v1466_v33  ;;  %v4793_v13 = vld [vmem:[#allocation30_spill] sm:$0xff]  ;;  %v1471_v7 = vmul.f32 %v1460_v44, %v2500_v60  ;;  %v4798_v48 = vld [vmem:[#allocation53_spill] sm:$0xff] }
 0x47c   : > { %1856 = vmatpush2.bf16.msra.mxu0 %v1767_v30  ;;  %1891 = vmatpush1.bf16.msra.mxu1 %v1773_v38  ;;  %v4080_v38 = vmul.f32 %v1393_v17, %v4792_v50  ;;  %v1386_v6 = vsel %vm405_vm5, %v4794_v10, %v4793_v13  ;;  %v1394_v36 = vsel %vm405_vm5, %v4793_v13, %v4794_v10  ;;  %v4800_v13 = vld [vmem:[#allocation43_spill] sm:$0xff] }
 0x47d   : > { %v4063_v15 = vpop.permute.xlu1 %1697  ;;  %1857 = vmatprep.subr.bf16.mxu0 %v4791_v4  ;;  %1892 = vmatprep.subr.bf16.mxu1 %v1772_v14  ;;  %v4076_v30 = vpop.permute.xlu0 %1679  ;;  %v4092_v14 = vmul.f32 %v1385_v58, %v4795_v52  ;;  %v1793_v34 = vpack.c.bf16 %v4041_v32, %v4030_v47  ;;  %v1764_v33 = vpack.c.bf16 %v1472_v37, %v1470_v11  ;;  %v4797_v58 = vld [vmem:[#allocation55_spill] sm:$0xff] }
 0x47e   : > { %v1794_v17 = vpack.c.bf16 %v4044_v3, %v4052_v5  ;;  %v1469_v23 = vmul.f32 %v1459_v22, %v2500_v60  ;;  %v1647_v20 = vsel %vm473_vm2, %v4796_v19, %v3835_v21  ;;  %v1655_v44 = vsel %vm473_vm2, %v3835_v21, %v4796_v19  ;;  %v4801_v10 = vld [vmem:[#allocation35_spill] sm:$0xff]  ;;  %v4803_v19 = vld [vmem:[#allocation46_spill] sm:$0xff]  ;;  %v4306_v3 = vld [vmem:[%s4504_s1 + $0x10] ss:$0 sm:$0xff] }
 0x47f   : > { %v4799_v4 = vpack.c.bf16 %v4797_v58, %v4798_v48  ;;  %v4116_v22 = vmul.f32 %v1394_v36, %v4792_v50  ;;  %v4119_v11 = vmul.f32 %v1386_v6, %v4795_v52  ;;  %v1643_v21 = vsel %vm473_vm2, %v4801_v10, %v4800_v13  ;;  %v4804_v58 = vld [vmem:[#allocation67_spill] sm:$0xff] }
 0x480   : > { %1893 = vmatpush1.bf16.msra.mxu1 %v1771_v63  ;;  %v1763_v62 = vpack.c.bf16 %v1471_v7, %v1469_v23  ;;  %v4802_v63 = vld [vmem:[#allocation39_spill] sm:$0xff]  ;;  %v1670_v31 = vmul.f32 %v1655_v44, %v4788_v46  ;;  %v1651_v7 = vsel %vm473_vm2, %v4800_v13, %v4801_v10  ;;  %v4805_v23 = vld [vmem:[#allocation66_spill] sm:$0xff]  ;;  %v1661_v53 = vmul.f32 %v1643_v21, %v4783_v54 }
 0x481   : > { %1858 = vmatpush2.bf16.msra.mxu0 %v4799_v4  ;;  %v4113_v37 = vpop.permute.xlu1 %1549  ;;  %1894 = vmatprep.subr.bf16.mxu1 %v1770_v43  ;;  %v1640_v8 = vpop.permute.xlu0 %1639  ;;  %v1652_v36 = vsel %vm473_vm2, %v4803_v19, %v4802_v63  ;;  %v1391_v4 = vsel %vm405_vm5, %v4805_v23, %v3872_v42  ;;  %v1644_v13 = vsel %vm473_vm2, %v4802_v63, %v4803_v19 }
 0x482   : > { %1859 = vmatprep.subr.bf16.mxu0 %v1764_v33  ;;  %v1648_v6 = vsel %vm473_vm2, %v4804_v58, %v1640_v8  ;;  %v1656_v48 = vsel %vm473_vm2, %v1640_v8, %v4804_v58  ;;  %v1669_v33 = vmul.f32 %v1647_v20, %v4783_v54  ;;  %v1399_v20 = vsel %vm405_vm5, %v3872_v42, %v4805_v23  ;;  %v4807_v42 = vld [vmem:[#allocation40_spill] sm:$0xff] }
 0x483   : > { %v1671_v40 = vmul.f32 %v1648_v6, %v4783_v54  ;;  %v1672_v43 = vmul.f32 %v1656_v48, %v4788_v46  ;;  %v1664_v10 = vmul.f32 %v1652_v36, %v4788_v46  ;;  %v4806_v48 = vld [vmem:[#allocation47_spill] sm:$0xff]  ;;  %v1413_v63 = vmul.f32 %v1399_v20, %v4792_v50 }
 0x484   : > { %1895 = vmatpush1.bf16.msra.mxu1 %v1769_v12  ;;  %v1396_v16 = vsel %vm405_vm5, %v4806_v48, %v4807_v42  ;;  %v1414_v19 = vmul.f32 %v1391_v4, %v4795_v52  ;;  %v1663_v20 = vmul.f32 %v1644_v13, %v4783_v54  ;;  %v1590_v21 = vsel %vm456_vm1, %v3789_v24, %v3761_v27 }
 0x485   : > { %1860 = vmatpush2.bf16.msra.mxu0 %v1763_v62  ;;  %v4157_v44 = vpop.permute.xlu1 %1565  ;;  %v1799_v8 = vpack.c.bf16 %v1671_v40, %v1669_v33  ;;  %v1384_v58 = vpop.permute.xlu0 %1383  ;;  %v1800_v6 = vpack.c.bf16 %v1672_v43, %v1670_v31  ;;  %v1388_v62 = vsel %vm405_vm5, %v4807_v42, %v4806_v48  ;;  %v1662_v31 = vmul.f32 %v1651_v7, %v4788_v46  ;;  %v4809_v40 = vld [vmem:[#allocation45_spill] sm:$0xff]  ;;  %v4810_v43 = vld [vmem:[#allocation38_spill] sm:$0xff]  ;;  %v4811_v42 = vld [vmem:[#allocation60_spill] sm:$0xff] }
 0x486   : > { %1861 = vmatprep.subr.bf16.mxu0 %v1762_v2  ;;  %v1392_v12 = vsel %vm405_vm5, %v4808_v41, %v1384_v58  ;;  %v1400_v2 = vsel %vm405_vm5, %v1384_v58, %v4808_v41  ;;  %v1387_v23 = vsel %vm405_vm5, %v4810_v43, %v4809_v40  ;;  %v1395_v58 = vsel %vm405_vm5, %v4809_v40, %v4810_v43  ;;  %v4812_v41 = vld [vmem:[#allocation58_spill] sm:$0xff] }
 0x487   : > { %v1415_v36 = vmul.f32 %v1400_v2, %v4792_v50  ;;  %v1416_v33 = vmul.f32 %v1392_v12, %v4795_v52  ;;  %1896 = vmatprep.subr.bf16.mxu1 %v1800_v6  ;;  %v1407_v7 = vmul.f32 %v1396_v16, %v4792_v50  ;;  %v4813_v12 = vpack.c.bf16 %v4811_v42, %v4812_v41 }
 0x488   : > { %1897 = vmatpush2.bf16.msra.mxu1 %v1799_v8  ;;  %v1753_v40 = vpack.c.bf16 %v4116_v22, %v4080_v38  ;;  %v1408_v1 = vmul.f32 %v1388_v62, %v4795_v52  ;;  %v1405_v13 = vmul.f32 %v1395_v58, %v4792_v50  ;;  %v1406_v8 = vmul.f32 %v1387_v23, %v4795_v52  ;;  %v4814_v62 = vld [vmem:[#allocation68_spill] sm:$0xff]  ;;  %v4820_v58 = vld [vmem:[#allocation62_spill] sm:$0xff] }
 0x489   : > { %1862 = vmatpush2.bf16.msra.mxu0 %v1761_v18  ;;  %v4194_v4 = vpop.permute.xlu1 %1677  ;;  %v1759_v6 = vpack.c.bf16 %v1415_v36, %v1413_v63  ;;  %v4198_v48 = vpop.permute.xlu0 %1695  ;;  %1898 = vmatprep.subr.bf16.mxu1 %v4813_v12  ;;  %v1760_v2 = vpack.c.bf16 %v1416_v33, %v1414_v19  ;;  %v1754_v18 = vpack.c.bf16 %v4119_v11, %v4092_v14  ;;  %v4815_v19 = vld [vmem:[#allocation59_spill] sm:$0xff]  ;;  %v4816_v36 = vld [vmem:[#allocation57_spill] sm:$0xff]  ;;  %v4819_v23 = vld [vmem:[#allocation64_spill] sm:$0xff] }
 0x48a   : > { %v1582_v16 = vsel %vm456_vm1, %v3761_v27, %v3789_v24  ;;  %v1796_v63 = vpack.c.bf16 %v1664_v10, %v1662_v31  ;;  %v1583_v14 = vsel %vm456_vm1, %v4814_v62, %v3912_v59  ;;  %v1591_v11 = vsel %vm456_vm1, %v3912_v59, %v4814_v62  ;;  %v4818_v27 = vld [vmem:[#allocation73_spill] sm:$0xff]  ;;  %v4822_v59 = vld [vmem:[#allocation4_spill] sm:$0xff] }
 0x48b   : > { %1863 = vmatprep.subr.bf16.mxu0 %v1760_v2  ;;  %v4817_v33 = vpack.c.bf16 %v4815_v19, %v4816_v36  ;;  %v1795_v31 = vpack.c.bf16 %v1663_v20, %v1661_v53  ;;  %v1755_v43 = vpack.c.bf16 %v1407_v7, %v1405_v13  ;;  %v1581_v24 = vsel %vm456_vm1, %v4818_v27, %v3979_v51  ;;  %v4824_v12 = vld [vmem:[#allocation48_spill] sm:$0xff]  ;;  %v4825_v53 = vld [vmem:[#allocation5_spill] sm:$0xff] }
 0x48c   : > { %v4821_v42 = vpack.c.bf16 %v4819_v23, %v4820_v58  ;;  %v1718_v20 = vsel %vm4823_vm4, %v3926_v55, %v3882_v57  ;;  %v1756_v7 = vpack.c.bf16 %v1408_v1, %v1406_v8  ;;  %v2216_v2 = vcombine.low %v4824_v12, %v4824_v12  ;;  %v4834_v23 = vld [vmem:[#allocation71_spill] sm:$0xff]  ;;  %vm4841_vm4 = vmmov %vm4840_vm0 }
 0x48d   : > { %1864 = vmatpush2.bf16.msra.mxu0 %v1759_v6  ;;  %1899 = vmatpush2.bf16.msra.mxu1 %v4817_v33  ;;  %v4230_v10 = vpop.permute.xlu1 %1693  ;;  %v4239_v41 = vpop.permute.xlu0 %1547  ;;  %v4242_v6 = vmul.f32 %v1582_v16, %v4822_v59  ;;  %v1604_v13 = vmul.f32 %v1590_v21, %v4825_v53  ;;  %v1605_v62 = vmul.f32 %v1583_v14, %v4822_v59  ;;  %v4829_v21 = vld [vmem:[#allocation63_spill] sm:$0xff]  ;;  %v4830_v14 = vld [vmem:[#allocation61_spill] sm:$0xff] }
 0x48e   : > { %1865 = vmatprep.subr.bf16.mxu0 %v4821_v42  ;;  %1900 = vmatprep.subr.bf16.mxu1 %v1796_v63  ;;  %v1606_v19 = vmul.f32 %v1591_v11, %v4825_v53  ;;  %v1589_v16 = vsel %vm456_vm1, %v3979_v51, %v4818_v27  ;;  %v4826_v63 = vld [vmem:[#allocation70_spill] sm:$0xff]  ;;  %v4266_v8 = vmul.f32 %v1581_v24, %v4822_v59  ;;  %v4280_v27 = vld [vmem:[%s4504_s1 + $0x18] ss:$0 sm:$0xff] }
 0x48f   : > { %v1711_v36 = vsel %vm4827_vm3, %v4826_v63, %v3946_v56  ;;  %v1719_v1 = vsel %vm4828_vm13, %v3946_v56, %v4826_v63  ;;  %v4831_v11 = vpack.c.bf16 %v4829_v21, %v4830_v14  ;;  %v1710_v51 = vsel %vm4832_vm9, %v3882_v57, %v3926_v55  ;;  %vm4842_vm3 = vmmov %vm4840_vm0 }
 0x490   : > { %v4283_v56 = vmul.f32 %v4280_v27, %v1718_v20  ;;  %v1602_v57 = vmul.f32 %v1589_v16, %v4825_v53  ;;  %v1587_v55 = vsel %vm456_vm1, %v4157_v44, %v4113_v37  ;;  %v1733_v5 = vmul.f32 %v4306_v3, %v1711_v36  ;;  %vm4844_vm13 = vmmov %vm4840_vm0 }
 0x491   : > { %1866 = vmatpush2.bf16.msra.mxu0 %v4831_v11  ;;  %1901 = vmatpush2.bf16.msra.mxu1 %v1795_v31  ;;  %v4271_v33 = vpop.permute.xlu1 %1545  ;;  %v1717_v31 = vsel %vm4833_vm12, %v4063_v15, %v4017_v49  ;;  %v1576_v24 = vpop.permute.xlu0 %1575  ;;  %v1789_v16 = vpack.c.bf16 %v4242_v6, %v4266_v8  ;;  %v1588_v63 = vsel %vm456_vm1, %v4026_v0, %v3950_v45  ;;  %vm4845_vm9 = vmmov %vm4840_vm0 }
 0x492   : > { %1867 = vmatprep.subr.bf16.mxu0 %v1756_v7  ;;  %1902 = vmatprep.subr.bf16.mxu1 %v1794_v17  ;;  %v1584_v58 = vsel %vm456_vm1, %v4834_v23, %v1576_v24  ;;  %v1592_v42 = vsel %vm456_vm1, %v1576_v24, %v4834_v23  ;;  %v1734_v17 = vmul.f32 %v4280_v27, %v1719_v1  ;;  %vm4847_vm12 = vmmov %vm4840_vm0 }
 0x493   : > { %v1607_v20 = vmul.f32 %v1584_v58, %v4822_v59  ;;  %v1608_v7 = vmul.f32 %v1592_v42, %v4825_v53  ;;  %v1730_v21 = vmul.f32 %v4280_v27, %v1717_v31  ;;  %v1709_v1 = vsel %vm4835_vm15, %v4017_v49, %v4063_v15  ;;  %v4836_v31 = vld [vmem:[#allocation72_spill] sm:$0xff]  ;;  %vm4848_vm15 = vmmov %vm4840_vm0 }
 0x494   : > { %v1598_v6 = vmul.f32 %v1587_v55, %v4825_v53  ;;  %v1790_v49 = vpack.c.bf16 %v1604_v13, %v1602_v57  ;;  %v1580_v15 = vsel %vm456_vm1, %v3950_v45, %v4026_v0  ;;  %v1716_v23 = vsel %vm4840_vm0, %v4198_v48, %v4076_v30 }
 0x495   : > { %1868 = vmatpush2.bf16.msra.mxu0 %v1755_v43  ;;  %1903 = vmatpush2.bf16.msra.mxu1 %v1793_v34  ;;  %v1562_v36 = vpop.permute.xlu1 %1561  ;;  %v1791_v8 = vpack.c.bf16 %v1607_v20, %v1605_v62  ;;  %v1704_v14 = vpop.permute.xlu0 %1703  ;;  %v1792_v11 = vpack.c.bf16 %v1608_v7, %v1606_v19  ;;  %v1579_v43 = vsel %vm456_vm1, %v4113_v37, %v4157_v44 }
 0x496   : > { %1869 = vmatprep.subr.bf16.mxu0 %v1754_v18  ;;  %v1712_v47 = vsel %vm4837_vm14, %v4836_v31, %v1704_v14  ;;  %v1720_v32 = vsel %vm4838_vm10, %v1704_v14, %v4836_v31  ;;  %v1600_v34 = vmul.f32 %v1588_v63, %v4825_v53  ;;  %v1729_v44 = vmul.f32 %v4306_v3, %v1709_v1  ;;  %v4846_v14 = vld [vmem:[#allocation51_spill] sm:$0xff]  ;;  %vm4849_vm10 = vmmov %vm4840_vm0 }
 0x497   : > { %v1735_v18 = vmul.f32 %v4306_v3, %v1712_v47  ;;  %v1736_v37 = vmul.f32 %v4280_v27, %v1720_v32  ;;  %1904 = vmatprep.subr.bf16.mxu1 %v1792_v11  ;;  %v1715_v62 = vsel %vm4839_vm11, %v4230_v10, %v4194_v4  ;;  %v1806_v0 = vpack.c.bf16 %v4283_v56, %v1730_v21  ;;  %vm4850_vm11 = vmmov %vm4840_vm0 }
 0x498   : > { %v1597_v13 = vmul.f32 %v1579_v43, %v4822_v59  ;;  %v1788_v55 = vpack.c.bf16 %v1600_v34, %v1598_v6  ;;  %v1707_v38 = vsel %vm4841_vm4, %v4194_v4, %v4230_v10  ;;  %v1585_v22 = vsel %vm456_vm1, %v1562_v36, %v4271_v33 }
 0x499   : > { %1870 = vmatpush2.bf16.msra.mxu0 %v1753_v40  ;;  %1905 = vmatpush2.bf16.msra.mxu1 %v1791_v8  ;;  %v1674_v45 = vpop.permute.xlu1 %1673  ;;  %v1807_v19 = vpack.c.bf16 %v1735_v18, %v1733_v5  ;;  %v1564_v24 = vpop.permute.xlu0 %1563  ;;  %v1808_v57 = vpack.c.bf16 %v1736_v37, %v1734_v17  ;;  %v1726_v56 = vmul.f32 %v4280_v27, %v1715_v62  ;;  %v2269_v62 = vld [vmem:[%s4509_s6 + $0x10] ss:$0 sps:$4 sm:$0xff]   ;;  %vm1835_vm14 = vcmask 523264  }
 0x49a   : > { %1906 = vmatprep.subr.bf16.mxu1 %v1790_v49  ;;  %v1586_v40 = vsel %vm456_vm1, %v1564_v24, %v4239_v41  ;;  %v1578_v58 = vsel %vm456_vm1, %v4239_v41, %v1564_v24  ;;  %v1731_v4 = vmul.f32 %v4306_v3, %v1710_v51  ;;  %v1599_v10 = vmul.f32 %v1580_v15, %v4822_v59 }
 0x49b   : > { %v1596_v42 = vmul.f32 %v1586_v40, %v4825_v53  ;;  %1929 = vmatprep.subr.bf16.mxu0 %v1808_v57  ;;  %v1708_v5 = vsel %vm4842_vm3, %v4076_v30, %v4198_v48  ;;  %v1728_v41 = vmul.f32 %v4280_v27, %v1716_v23  ;;  %v1577_v17 = vsel %vm456_vm1, %v4271_v33, %v1562_v36 }
 0x49c   : > { %1872 = vmatmul.mubr.bf16.vlgmr.msra.gmra.mxu0 %v2216_v2  ;;  %v1594_v12 = vmul.f32 %v1585_v22, %v4825_v53  ;;  %v1805_v20 = vpack.c.bf16 %v1731_v4, %v1729_v44  ;;  %v1787_v7 = vpack.c.bf16 %v1599_v10, %v1597_v13  ;;  %v1725_v63 = vmul.f32 %v4306_v3, %v1707_v38 }
 0x49d   : > { %1907 = vmatpush2.bf16.msra.mxu1 %v1789_v16  ;;  %1930 = vmatpush1.bf16.msra.mxu0 %v1807_v19  ;;  %v1690_v2 = vpop.permute.xlu1 %1689  ;;  %v1676_v51 = vpop.permute.xlu0 %1675  ;;  %v1595_v30 = vmul.f32 %v1578_v58, %v4822_v59  ;;  %v4843_v48 = vmov 0   ;;  %v1727_v16 = vmul.f32 %v4306_v3, %v1708_v5  ;;  %v1804_v21 = vpack.c.bf16 %v1728_v41, %v1726_v56 }
 0x49e   : > { %1931 = vmatprep.subr.bf16.mxu0 %v1806_v0  ;;  %1908 = vmatprep.subr.bf16.mxu1 %v1788_v55  ;;  %v1786_v1 = vpack.c.bf16 %v1596_v42, %v1594_v12  ;;  %v1593_v33 = vmul.f32 %v1577_v17, %v4822_v59  ;;  %v1705_v36 = vsel %vm4844_vm13, %v1674_v45, %v1690_v2  ;;  %vm4851_vm0 = vcmask 1043456  }
 0x49f   : > { %1953 = vmatprep.mubr.bf16.mxu0 %v4843_v48  ;;  %v1713_v6 = vsel %vm4845_vm9, %v1690_v2, %v1674_v45  ;;  %v2218_v11 = vcombine.low %v4846_v14, %v4846_v14  ;;  %v1803_v43 = vpack.c.bf16 %v1727_v16, %v1725_v63  ;;  %v1721_v49 = vmul.f32 %v4306_v3, %v1705_v36  ;;  %vm4852_vm4 = vmmov %vm4851_vm0 }
 0x4a0   : > { %v1785_v31 = vpack.c.bf16 %v1595_v30, %v1593_v33  ;;  %v1722_v15 = vmul.f32 %v4280_v27, %v1713_v6 }
 0x4a1   : > { %1909 = vmatpush2.bf16.msra.mxu1 %v1787_v7  ;;  %1932 = vmatpush1.bf16.msra.mxu0 %v1805_v20  ;;  %v1692_v8 = vpop.permute.xlu0 %1691 }
 0x4a2   : > { %1933 = vmatprep.subr.bf16.mxu0 %v1804_v21  ;;  %1910 = vmatprep.subr.bf16.mxu1 %v1786_v1  ;;  %v1706_v47 = vsel %vm4847_vm12, %v1676_v51, %v1692_v8  ;;  %v1714_v32 = vsel %vm4848_vm15, %v1692_v8, %v1676_v51  ;;  %v2039_v51 = vld [vmem:[%s4512_s9] sm:$0xff] }
 0x4a3   : > { %v1723_v34 = vmul.f32 %v4306_v3, %v1706_v47  ;;  %v1724_v18 = vmul.f32 %v4280_v27, %v1714_v32 }
 0x4a5   : > { %1911 = vmatpush2.bf16.msra.mxu1 %v1785_v31  ;;  %1934 = vmatpush1.bf16.msra.mxu0 %v1803_v43  ;;  %v1801_v37 = vpack.c.bf16 %v1723_v34, %v1721_v49  ;;  %v1802_v44 = vpack.c.bf16 %v1724_v18, %v1722_v15 }
 0x4a7   : > { %1935 = vmatprep.subr.bf16.mxu0 %v1802_v44 }
 0x4a8   : > { %1913 = vmatmul.mubr.bf16.vlgmr.msra.gmra.mxu1 %v2218_v11 }
 0x4a9   : > { %1936 = vmatpush1.bf16.msra.mxu0 %v1801_v37 }
 0x4aa   : > { %v1816_v24 = vpop.permute.xlu1 %1815 }
 0x4ac   : > { %2221 = vmatmul.mubr.msk.bf16.vlgmr.msra.gmra.mxu0 %vm1835_vm14, %v2269_v62 }
 0x4ad   : > { %2086 = vmatprep.mubr.bf16.mxu0 %v4843_v48 }
 0x55c   : > { %v1873_v45 = vpop.f32.mrf.mxu0 }
 0x55d   : > { %v1874_v55 = vadd.f32 %v1873_v45, %v1816_v24 }
 0x55e   : > { %v1875_v0 = vpop.f32.mrf.mxu0 }
 0x55f   : > { %v1876_v38 = vadd.f32 %v1875_v0, %v1816_v24 }
 0x560   : > { %v1877_v13 = vpop.f32.mrf.mxu0 }
 0x562   : > { %v1878_v19 = vpop.f32.mrf.mxu0 }
 0x568   : > { %v1914_v57 = vpop.f32.mrf.mxu1 }
 0x569   : > { %v1915_v22 = vadd.f32 %v1914_v57, %v1874_v55 }
 0x56a   : > { %v1916_v23 = vpop.f32.mrf.mxu1 }
 0x56b   : > { %v1917_v58 = vadd.f32 %v1916_v23, %v1876_v38 }
 0x56c   : > { %v1955_v40 = vpop.f32.mrf.mxu0  ;;  %v1918_v56 = vpop.f32.mrf.mxu1 }
 0x56d   : > { %v1956_v42 = vadd.f32 %v1955_v40, %v1915_v22 }
 0x56e   : > { %v1957_v4 = vpop.f32.mrf.mxu0  ;;  %v1919_v10 = vpop.f32.mrf.mxu1 }
 0x56f   : > { %v4410_v5 = vmax.f32 %v1956_v42, 0.0  ;;  %v1958_v41 = vadd.f32 %v1957_v4, %v1917_v58 }
 0x570   : > { %v1959_v17 = vpop.f32.mrf.mxu0 }
 0x571   : > { %v1963_v12 = vmax.f32 %v1958_v41, 0.0  ;;  %2020 = vrot.lane.b32.xlu0 %v4410_v5, %s2281_s20 }
 0x572   : > { %v1960_v2 = vpop.f32.mrf.mxu0 }
 0x573   : > { %2022 = vrot.lane.b32.xlu1 %v1963_v12, %s2281_s20 }
 0x575   : > { %2004 = vrot.lane.b32.xlu0 %v4410_v5, %s2280_s19 }
 0x577   : > { %2006 = vrot.lane.b32.xlu1 %v1963_v12, %s2280_s19 }
 0x579   : > { %2012 = vrot.lane.b32.xlu0 %v4410_v5, %s2282_s21 }
 0x57b   : > { %2014 = vrot.lane.b32.xlu1 %v1963_v12, %s2282_s21 }
 0x57d   : > { %1996 = vrot.lane.b32.xlu0 %v4410_v5, %s2283_s22 }
 0x57f   : > { %1998 = vrot.lane.b32.xlu1 %v1963_v12, %s2283_s22 }
 0x581   : > { %1980 = vrot.lane.b32.xlu0 %v4410_v5, %s2284_s23 }
 0x583   : > { %1982 = vrot.lane.b32.xlu1 %v1963_v12, %s2284_s23  ;;  %s2180_s23 = sshll.u32 %s4859_s14, 1 }
 0x585   : > { %1988 = vrot.lane.b32.xlu0 %v4410_v5, %s2285_s24 }
 0x587   : > { %1990 = vrot.lane.b32.xlu1 %v1963_v12, %s2285_s24 }
 0x589   : > { %1964 = vrot.lane.b32.xlu0 %v4410_v5, %s2287_s25 }
 0x58b   : > { %1966 = vrot.lane.b32.xlu1 %v1963_v12, %s2287_s25 }
 0x58d   : > { %1972 = vrot.lane.b32.xlu0 %v4410_v5, %s2288_s26 }
 0x58f   : > { %1974 = vrot.lane.b32.xlu1 %v1963_v12, %s2288_s26  ;;  %s357_s26 = scalar_lea.vmem %s4513_s10, %s2180_s23 }
 0x591   : > { %2042 = vperm.xlu0 %2245, %v2039_v51  }
 0x5e3   : > { %v2021_v20 = vpop.permute.xlu0 %2020 }
 0x5e5   : > { %v2023_v7 = vpop.permute.xlu1 %2022 }
 0x5e6   : > { %v2024_v63 = vsel %vm4849_vm10, %v2021_v20, %v2023_v7  ;;  %v2025_v30 = vsel %vm4850_vm11, %v2023_v7, %v2021_v20  ;;  %v2038_v20 = vld [vmem:[%s4511_s8] sm:$0xf] }
 0x5e7   : > { %v2026_v48 = vmul.f32 %v4306_v3, %v2024_v63  ;;  %v2027_v16 = vmul.f32 %v4280_v27, %v2025_v30  ;;  %v2005_v21 = vpop.permute.xlu0 %2004 }
 0x5e9   : > { %v2036_v1 = vpack.c.bf16 %v2026_v48, %v2026_v48  ;;  %v2037_v33 = vpack.c.bf16 %v2027_v16, %v2027_v16  ;;  %v2007_v36 = vpop.permute.xlu1 %2006 }
 0x5ea   : > { %v2008_v14 = vsel %vm456_vm1, %v2005_v21, %v2007_v36  ;;  %v2009_v11 = vsel %vm456_vm1, %v2007_v36, %v2005_v21  ;;  %vm4853_vm1 = vcmp.lt.s32.totalorder %v2414_v9, 127  ;;  %v2289_v9 = vmov 1966171168  }
 0x5eb   : > { %2222 = vmatprep.subr.msk.bf16.mxu0 %vm4851_vm0, %v2037_v33  ;;  %v2013_v6 = vpop.permute.xlu0 %2012  ;;  %v2049_v8 = vsel %vm4852_vm4, %v2036_v1, 0  ;;  %v2010_v31 = vmul.f32 %v2008_v14, %v4822_v59  ;;  %v2011_v47 = vmul.f32 %v2009_v11, %v4825_v53  ;;  %vm4854_vm3 = vmmov %vm4853_vm1  ;;  %v2101_v7 = vunpack.c.l.s4 %v2289_v9  ;;  %v4856_v1 = vld [vmem:[#allocation2_spill] sm:$0xff] }
 0x5ec   : > { %2061 = vmatpush1.bf16.msra.mxu0 %v2049_v8  ;;  %v4857_v14 = vlaneseq }
 0x5ed   : > { %v2015_v43 = vpop.permute.xlu1 %2014  ;;  %v2102_v30 = vunpack.c.0.s8 %v2101_v7 }
 0x5ee   : > { %v2016_v27 = vsel %vm473_vm2, %v2013_v6, %v2015_v43  ;;  %v2017_v3 = vsel %vm473_vm2, %v2015_v43, %v2013_v6  ;;  %vm4855_vm2 = vcmask 588800  }
 0x5ef   : > { %v2018_v32 = vmul.f32 %v2016_v27, %v4783_v54  ;;  %v2019_v49 = vmul.f32 %v2017_v3, %v4788_v46  ;;  %v1997_v15 = vpop.permute.xlu0 %1996  ;;  %v2105_v33 = vsub.s32 %v2102_v30, %v4856_v1 }
 0x5f1   : > { %v2034_v34 = vpack.c.bf16 %v2018_v32, %v2010_v31  ;;  %v1999_v18 = vpop.permute.xlu1 %1998  ;;  %v2035_v37 = vpack.c.bf16 %v2019_v49, %v2011_v47 }
 0x5f2   : > { %v2000_v44 = vsel %vm4853_vm1, %v1997_v15, %v1999_v18  ;;  %v2001_v62 = vsel %vm4854_vm3, %v1999_v18, %v1997_v15 }
 0x5f3   : > { %v2002_v45 = vmul.f32 %v2000_v44, %v2466_v35  ;;  %v2003_v59 = vmul.f32 %v2001_v62, %v2474_v39  ;;  %2062 = vmatprep.subr.bf16.mxu0 %v2035_v37  ;;  %v1981_v53 = vpop.permute.xlu0 %1980 }
 0x5f4   : > { %2063 = vmatpush1.bf16.msra.mxu0 %v2034_v34 }
 0x5f5   : > { %v2032_v54 = vpack.c.bf16 %v2002_v45, %v4410_v5  ;;  %v1983_v46 = vpop.permute.xlu1 %1982  ;;  %v2033_v0 = vpack.c.bf16 %v2003_v59, %v1963_v12 }
 0x5f6   : > { %v1984_v19 = vsel %vm405_vm5, %v1981_v53, %v1983_v46  ;;  %v1985_v24 = vsel %vm405_vm5, %v1983_v46, %v1981_v53  ;;  %vm2117_vm5 = vcmp.lt.s32.totalorder %v4857_v14, 256 }
 0x5f7   : > { %2064 = vmatprep.subr.bf16.mxu0 %v2033_v0  ;;  %v1989_v13 = vpop.permute.xlu0 %1988  ;;  %v1986_v55 = vmul.f32 %v1985_v24, %v4792_v50  ;;  %v1987_v23 = vmul.f32 %v1984_v19, %v4795_v52 }
 0x5f8   : > { %2065 = vmatpush1.bf16.msra.mxu0 %v2032_v54 }
 0x5f9   : > { %v1991_v57 = vpop.permute.xlu1 %1990 }
 0x5fa   : > { %v1992_v35 = vsel %vm422_vm6, %v1989_v13, %v1991_v57  ;;  %v1993_v39 = vsel %vm422_vm6, %v1991_v57, %v1989_v13 }
 0x5fb   : > { %v1994_v38 = vmul.f32 %v1993_v39, %v2500_v60  ;;  %v1995_v22 = vmul.f32 %v1992_v35, %v2503_v61  ;;  %v1965_v40 = vpop.permute.xlu0 %1964 }
 0x5fd   : > { %v2030_v56 = vpack.c.bf16 %v1994_v38, %v1986_v55  ;;  %v1967_v58 = vpop.permute.xlu1 %1966  ;;  %v2031_v42 = vpack.c.bf16 %v1995_v22, %v1987_v23 }
 0x5fe   : > { %v1968_v4 = vsel %vm371_vm7, %v1965_v40, %v1967_v58  ;;  %v1969_v10 = vsel %vm371_vm7, %v1967_v58, %v1965_v40 }
 0x5ff   : > { %2066 = vmatprep.subr.bf16.mxu0 %v2031_v42  ;;  %v1973_v5 = vpop.permute.xlu0 %1972  ;;  %v1970_v61 = vmul.f32 %v1969_v10, %v2522_v25  ;;  %v1971_v41 = vmul.f32 %v1968_v4, %v2525_v26 }
 0x600   : > { %2067 = vmatpush1.bf16.msra.mxu0 %v2030_v56 }
 0x601   : > { %v1975_v50 = vpop.permute.xlu1 %1974 }
 0x602   : > { %v1976_v52 = vsel %vm388_vm8, %v1973_v5, %v1975_v50  ;;  %v1977_v60 = vsel %vm388_vm8, %v1975_v50, %v1973_v5 }
 0x603   : > { %v1978_v17 = vmul.f32 %v1977_v60, %v2528_v28  ;;  %v1979_v12 = vmul.f32 %v1976_v52, %v2531_v29 }
 0x605   : > { %v2028_v2 = vpack.c.bf16 %v1978_v17, %v1970_v61  ;;  %v2029_v51 = vpack.c.bf16 %v1979_v12, %v1971_v41 }
 0x607   : > { %2068 = vmatprep.subr.bf16.mxu0 %v2029_v51 }
 0x608   : > { %2069 = vmatpush1.bf16.msra.mxu0 %v2028_v2 }
 0x60b   : > { %2223 = vmatmul.mubr.msk.bf16.vlgmr.msra.gmra.mxu0 %vm4855_vm2, %v2038_v20 }
 0x60c   : > { %v2043_v25 = vpop.permute.xlu0 %2042 }
 0x6cb   : > { %v2088_v63 = vpop.f32.mrf.mxu0 }
 0x6cc   : > { %v2089_v26 = vadd.f32 %v2088_v63, %v2043_v25 }
 0x6cd   : > { %v2090_v28 = vpop.f32.mrf.mxu0 }
 0x6ce   : > { %v2091_v48 = vadd.f32 %v2090_v28, %v2043_v25  ;;  %v2095_v16 = vmax.f32 %v2089_v26, 0.0 }
 0x6cf   : > { %v2092_v29 = vpop.f32.mrf.mxu0 }
 0x6d0   : > { %v2096_v21 = vmax.f32 %v2091_v48, 0.0 }
 0x6d1   : > { %v2093_v36 = vpop.f32.mrf.mxu0 }
 0x6d2   : > { %v2099_v6 = vcombine.low %v2095_v16, %v2096_v21 }
 0x6d4   : > { %v2106_v8 = vrot.slane %v2099_v6, %v2105_v33 }
 0x6d6   : > { %v2113_v11 = vrot.slane %v2106_v8, %v2105_v33 }
 0x6d8   : > { %2119 = vst.msk [vmem:[%s357_s26] sm:$0x3] %vm2117_vm5, %v2113_v11 }
 0x6d9 PF: > { %s20_s13 = sadd.s32 1, %s2278_s13  }
 0x6da   : > { %p17_p4 = scmp.ge.s32.totalorder %s20_s13, 4  }
 0x6dc   :  { %19 = sbr.rel (!%p17_p4) target bundleno = 1 (0x1), region = 90 }

</bundles_post_ra>
